<compile_context>
chip_gen: v5e
topology: v5e:2x2
jax: 0.10.0
libtpu: 0.0.40
codegen_flags: <defaults>
</compile_context>

<pallas_src>
import functools

import jax
import jax.numpy as jnp
from jax.experimental import pallas as pl
from jax.experimental.pallas import tpu as pltpu

_MIN_PALLAS_N = 128                 # below this, plain XLA wins
_NUM_INPUT_BUFFERS = 2              # double-buffer: more buys no HBM bandwidth
_MAX_BLOCK_ROWS = 1024
_F32_TEMP_BYTES = 12                # per-element f32 temps per stream (x-m, exp, where)
_MASK_BYTES = 1                     # (TM, N) bool diag mask


def _vmem_budget():
    """(vmem_limit_bytes, working-set budget) sized from the chip's VMEM."""
    try:
        phys = int(pltpu.get_tpu_info().vmem_capacity_bytes)
        if phys <= 0:
            raise ValueError
    except Exception:
        phys = 64 * 1024 * 1024     # conservative (v7x-sized) fallback
    limit = min((phys * 3) // 4, 112 * 1024 * 1024)      # ~96 MiB v5e/v6e, ~48 MiB v7x
    limit = max(limit, 16 * 1024 * 1024)
    work_budget = max(limit - 8 * 1024 * 1024, 8 * 1024 * 1024)   # headroom
    return int(limit), int(work_budget)


def _pick_block_rows(n, itemsize, work_budget, requested=None):
    """Largest row tile whose full working set fits the VMEM budget."""
    if requested is None:
        bytes_per_row = n * (2 * _NUM_INPUT_BUFFERS * itemsize   # pipelined input windows
                             + 2 * _F32_TEMP_BYTES               # f32 temps, both streams
                             + _MASK_BYTES)
        tm = work_budget // bytes_per_row
        tm = min(_MAX_BLOCK_ROWS, max(8, tm))
        tm = min(tm, max(8, n // 2))     # >= 2 row blocks so both v7x cores get work
    else:
        tm = min(int(requested), n)
    if tm != n:
        # Block sublane dim must be a multiple of 8 unless it equals the full dim.
        tm = max(8, (tm // 8) * 8)
    return int(tm)


def _contrastive_partial_kernel(li_ref, lg_ref, out_ref, *,
                                n_total, block_rows, n_inner):
    """Accumulate sum_i( lse_i - x_ii ) of both matrices over this row block."""
    o = pl.program_id(0)                 # outer ("parallel") axis: one accumulator each
    j = pl.program_id(1)                 # inner ("arbitrary") axis: streamed row blocks
    blk = o * n_inner + j                # global row-block index (may exceed nb: masked)
    row0 = blk * block_rows

    @pl.when(j == 0)
    def _():
        out_ref[...] = jnp.zeros_like(out_ref)

    li = li_ref[...].astype(jnp.float32)
    lg = lg_ref[...].astype(jnp.float32)

    # Small iotas + broadcasted compare: no materialized (TM, N) int32 temps.
    grow = jax.lax.broadcasted_iota(jnp.int32, (block_rows, 1), 0) + row0   # (TM, 1)
    gcol = jax.lax.broadcasted_iota(jnp.int32, (1, n_total), 1)             # (1, N)
    diag_mask = grow == gcol                                                # (TM, N)
    row_valid = grow < n_total                                              # (TM, 1)

    def lse_minus_diag(x):
        # Numerically-stable logsumexp along the class (lane) axis, kept 2-D.
        m = jnp.max(x, axis=-1, keepdims=True)                               # (TM, 1)
        lse = m + jnp.log(jnp.sum(jnp.exp(x - m), axis=-1, keepdims=True))   # (TM, 1)
        diag = jnp.sum(jnp.where(diag_mask, x, 0.0), axis=-1, keepdims=True) # (TM, 1)
        return lse - diag                                                    # (TM, 1)

    vals = lse_minus_diag(li) + lse_minus_diag(lg)                 # (TM, 1)
    vals = jnp.where(row_valid, vals, 0.0)                         # padded / dup rows -> 0
    partial = jnp.sum(vals, axis=0, keepdims=True)                 # (1, 1)

    out_ref[...] += partial.reshape(1, 1, 1)


def contrastive_loss(logits_per_image, logits_per_graph, *, block_rows=None):
    """0.5 * (CE(logits_per_image, diag) + CE(logits_per_graph, diag))."""
    li = logits_per_image
    lg = logits_per_graph
    assert li.shape == lg.shape and li.ndim == 2 and li.shape[0] == li.shape[1], \
        "contrastive logits must be square [N, N] with matching shapes"
    n = li.shape[0]

    if n < _MIN_PALLAS_N:
        # Pure-XLA path: Pallas launch + per-step overhead would dominate here.
        def ce(x):
            x = x.astype(jnp.float32)
            return jnp.mean(jax.nn.logsumexp(x, axis=-1) - jnp.diagonal(x))
        return (ce(li) + ce(lg)) * 0.5

    vmem_limit, work_budget = _vmem_budget()
    itemsize = jnp.dtype(li.dtype).itemsize
    tm = _pick_block_rows(n, itemsize, work_budget, block_rows)
    nb = pl.cdiv(n, tm)
    n_outer = 2 if nb >= 2 else 1        # give both v7x TensorCores a shard
    n_inner = pl.cdiv(nb, n_outer)

    kernel = functools.partial(_contrastive_partial_kernel,
                               n_total=n, block_rows=tm, n_inner=n_inner)

    def in_index(o, j):
        # Clamp the padded grid cell (when n_outer * n_inner > nb) to a valid
        # block; its rows are masked out inside the kernel anyway.
        return (jnp.minimum(o * n_inner + j, nb - 1), 0)

    in_spec = pl.BlockSpec((tm, n), in_index,
                           pipeline_mode=pl.Buffered(_NUM_INPUT_BUFFERS))

    partials = pl.pallas_call(
        kernel,
        out_shape=jax.ShapeDtypeStruct((n_outer, 1, 1), jnp.float32),
        grid_spec=pl.GridSpec(
            grid=(n_outer, n_inner),
            in_specs=[in_spec, in_spec],
            # Output block is resident across the inner (reduction) axis ->
            # in-kernel accumulation; one tiny HBM writeback per outer shard.
            out_specs=pl.BlockSpec((1, 1, 1), lambda o, j: (o, 0, 0)),
        ),
        compiler_params=pltpu.CompilerParams(
            dimension_semantics=("parallel", "arbitrary"),
            vmem_limit_bytes=vmem_limit,
        ),
    )(li, lg)

    return jnp.sum(partials) * (0.5 / n)


class SetCriterion:
    """Drop-in style wrapper mirroring the PyTorch module's interface."""

    def __init__(self, weight_dict, losses):
        self.weight_dict = weight_dict   # not applied inside forward (same as torch)
        self.losses = losses

    def loss_contrastive(self, outputs, targets, log=True):
        loss = contrastive_loss(outputs['logits_per_image'],
                                outputs['logits_per_graph'])
        return {'loss_cont': loss}

    def get_loss(self, loss, outputs, targets, **kwargs):
        loss_map = {'contrastive': self.loss_contrastive}
        assert loss in loss_map, f'do you really want to compute {loss} loss?'
        return loss_map[loss](outputs, targets, **kwargs)

    def forward(self, outputs, targets):
        losses = {}
        for loss in self.losses:
            losses.update(self.get_loss(loss, outputs, targets))
        return losses

    __call__ = forward


if __name__ == "__main__":
    key = jax.random.PRNGKey(0)
    k1, k2, k3, k4 = jax.random.split(key, 4)

    def ref_loss(a, b):
        def ce(x):
            x = x.astype(jnp.float32)
            return jnp.mean(jax.nn.logsumexp(x, axis=-1) - jnp.diagonal(x))
        return (ce(a) + ce(b)) * 0.5

    # ---- Pallas path: N=320, explicit block_rows=128 -> nb=3 (odd), so the
    #      2-core grid has one clamped/padded cell and a partial last block.
    N = 320
    li = jax.random.normal(k1, (N, N), dtype=jnp.float32) * 3.0
    lg = jax.random.normal(k2, (N, N), dtype=jnp.float32) * 3.0
    ref = ref_loss(li, lg)

    loss_val = jax.block_until_ready(contrastive_loss(li, lg, block_rows=128))
    assert jnp.allclose(loss_val, ref, rtol=1e-4, atol=1e-5), (loss_val, ref)

    # ---- Pallas path with auto-sized tile (exercises VMEM-budget TM picking).
    loss_auto = jax.block_until_ready(contrastive_loss(li, lg))
    assert jnp.allclose(loss_auto, ref, rtol=1e-4, atol=1e-5), (loss_auto, ref)

    # ---- Module-style call; tiny N exercises the pure-XLA fallback path.
    n_small = 8
    outputs = {
        'logits_per_image': jax.random.normal(k3, (n_small, n_small), jnp.float32) * 3.0,
        'logits_per_graph': jax.random.normal(k4, (n_small, n_small), jnp.float32) * 3.0,
    }
    targets = [{} for _ in range(n_small)]   # unused by the contrastive loss
    criterion = SetCriterion(weight_dict={'loss_cont': 1.0}, losses=['contrastive'])
    losses = criterion(outputs, targets)
    small = jax.block_until_ready(losses['loss_cont'])
    ref_small = ref_loss(outputs['logits_per_image'], outputs['logits_per_graph'])
    assert jnp.allclose(small, ref_small, rtol=1e-4, atol=1e-5), (small, ref_small)

    print("KERNEL_OK")
</pallas_src>

<mosaic_0001>
module attributes {stable_mosaic.version = 11 : i64} {
  func.func @_contrastive_partial_kernel(%arg0: i32, %arg1: i32, %arg2: memref<128x320xf32, #tpu.memory_space<vmem>>, %arg3: memref<128x320xf32, #tpu.memory_space<vmem>>, %arg4: memref<1x1x1xf32, #tpu.memory_space<vmem>>) attributes {dimension_semantics = [#tpu.dimension_semantics<parallel>, #tpu.dimension_semantics<arbitrary>], iteration_bounds = array<i64: 2, 2>, scalar_prefetch = 0 : i64, scratch_operands = 0 : i64, tpu.core_type = #tpu.core_type<tc>, window_params = [{pipeline_mode = #tpu.pipeline_mode<double_buffered>, transform_indices = @transform_0, window_bounds = array<i64: 128, 320>}, {pipeline_mode = #tpu.pipeline_mode<double_buffered>, transform_indices = @transform_1, window_bounds = array<i64: 128, 320>}, {transform_indices = @transform_2, window_bounds = array<i64: 1, 1, 1>}]} {
    %c2_i32 = arith.constant 2 : i32
    %0 = arith.muli %arg0, %c2_i32 : i32
    %1 = arith.addi %0, %arg1 : i32
    %c128_i32 = arith.constant 128 : i32
    %2 = arith.muli %1, %c128_i32 : i32
    %c0_i32 = arith.constant 0 : i32
    %3 = arith.cmpi eq, %arg1, %c0_i32 : i32
    %4 = arith.extui %3 : i1 to i32
    %c0_i32_0 = arith.constant 0 : i32
    %5 = arith.cmpi ne, %4, %c0_i32_0 : i32
    scf.if %5 {
      %cst_19 = arith.constant 0.000000e+00 : f32
      %54 = vector.broadcast %cst_19 : f32 to vector<1x1x1xf32>
      %c0_20 = arith.constant 0 : index
      %c0_21 = arith.constant 0 : index
      %c0_22 = arith.constant 0 : index
      %55 = vector.load %arg4[%c0_20, %c0_21, %c0_22] : memref<1x1x1xf32, #tpu.memory_space<vmem>>, vector<1x1x1xf32>
      tpu.vector_store %arg4[%c0_20, %c0_21, %c0_22], %54 {strides = array<i32>} : memref<1x1x1xf32, #tpu.memory_space<vmem>>, vector<1x1x1xf32>,
    } else {
    }
    %c0 = arith.constant 0 : index
    %c0_1 = arith.constant 0 : index
    %6 = vector.load %arg2[%c0, %c0_1] : memref<128x320xf32, #tpu.memory_space<vmem>>, vector<128x320xf32>
    %c0_2 = arith.constant 0 : index
    %c0_3 = arith.constant 0 : index
    %7 = vector.load %arg3[%c0_2, %c0_3] : memref<128x320xf32, #tpu.memory_space<vmem>>, vector<128x320xf32>
    %8 = tpu.iota {dimensions = array<i32: 0>} : vector<128x1xi32>
    %9 = vector.broadcast %2 : i32 to vector<128x1xi32>
    %10 = arith.addi %8, %9 : vector<128x1xi32>
    %11 = tpu.iota {dimensions = array<i32: 1>} : vector<1x320xi32>
    %12 = vector.broadcast %10 : vector<128x1xi32> to vector<128x320xi32>
    %13 = vector.broadcast %11 : vector<1x320xi32> to vector<128x320xi32>
    %14 = arith.cmpi eq, %12, %13 : vector<128x320xi32>
    %c320_i32 = arith.constant 320 : i32
    %15 = vector.broadcast %c320_i32 : i32 to vector<128x1xi32>
    %16 = arith.cmpi slt, %10, %15 : vector<128x1xi32>
    %cst = arith.constant dense<0xFF800000> : vector<128xf32>
    %17 = vector.multi_reduction <maximumf>, %6, %cst [1] : vector<128x320xf32> to vector<128xf32>
    %18 = vector.shape_cast %17 : vector<128xf32> to vector<128x1xf32>
    %19 = vector.broadcast %18 : vector<128x1xf32> to vector<128x320xf32>
    %20 = arith.subf %6, %19 : vector<128x320xf32>
    %21 = math.exp %20 : vector<128x320xf32>
    %cst_4 = arith.constant dense<0.000000e+00> : vector<128xf32>
    %22 = vector.multi_reduction <add>, %21, %cst_4 [1] : vector<128x320xf32> to vector<128xf32>
    %23 = vector.shape_cast %22 : vector<128xf32> to vector<128x1xf32>
    %24 = math.log %23 : vector<128x1xf32>
    %25 = arith.addf %18, %24 : vector<128x1xf32>
    %cst_5 = arith.constant 0.000000e+00 : f32
    %26 = vector.broadcast %cst_5 : f32 to vector<128x320xf32>
    %27 = arith.select %14, %6, %26 : vector<128x320xi1>, vector<128x320xf32>
    %cst_6 = arith.constant dense<0.000000e+00> : vector<128xf32>
    %28 = vector.multi_reduction <add>, %27, %cst_6 [1] : vector<128x320xf32> to vector<128xf32>
    %29 = vector.shape_cast %28 : vector<128xf32> to vector<128x1xf32>
    %30 = arith.subf %25, %29 : vector<128x1xf32>
    %cst_7 = arith.constant dense<0xFF800000> : vector<128xf32>
    %31 = vector.multi_reduction <maximumf>, %7, %cst_7 [1] : vector<128x320xf32> to vector<128xf32>
    %32 = vector.shape_cast %31 : vector<128xf32> to vector<128x1xf32>
    %33 = vector.broadcast %32 : vector<128x1xf32> to vector<128x320xf32>
    %34 = arith.subf %7, %33 : vector<128x320xf32>
    %35 = math.exp %34 : vector<128x320xf32>
    %cst_8 = arith.constant dense<0.000000e+00> : vector<128xf32>
    %36 = vector.multi_reduction <add>, %35, %cst_8 [1] : vector<128x320xf32> to vector<128xf32>
    %37 = vector.shape_cast %36 : vector<128xf32> to vector<128x1xf32>
    %38 = math.log %37 : vector<128x1xf32>
    %39 = arith.addf %32, %38 : vector<128x1xf32>
    %cst_9 = arith.constant 0.000000e+00 : f32
    %40 = vector.broadcast %cst_9 : f32 to vector<128x320xf32>
    %41 = arith.select %14, %7, %40 : vector<128x320xi1>, vector<128x320xf32>
    %cst_10 = arith.constant dense<0.000000e+00> : vector<128xf32>
    %42 = vector.multi_reduction <add>, %41, %cst_10 [1] : vector<128x320xf32> to vector<128xf32>
    %43 = vector.shape_cast %42 : vector<128xf32> to vector<128x1xf32>
    %44 = arith.subf %39, %43 : vector<128x1xf32>
    %45 = arith.addf %30, %44 : vector<128x1xf32>
    %cst_11 = arith.constant 0.000000e+00 : f32
    %46 = vector.broadcast %cst_11 : f32 to vector<128x1xf32>
    %47 = arith.select %16, %45, %46 : vector<128x1xi1>, vector<128x1xf32>
    %cst_12 = arith.constant dense<0.000000e+00> : vector<1xf32>
    %48 = vector.multi_reduction <add>, %47, %cst_12 [0] : vector<128x1xf32> to vector<1xf32>
    %49 = vector.shape_cast %48 : vector<1xf32> to vector<1x1xf32>
    %c0_13 = arith.constant 0 : index
    %c0_14 = arith.constant 0 : index
    %c0_15 = arith.constant 0 : index
    %50 = vector.load %arg4[%c0_13, %c0_14, %c0_15] : memref<1x1x1xf32, #tpu.memory_space<vmem>>, vector<1x1x1xf32>
    %51 = vector.shape_cast %49 : vector<1x1xf32> to vector<1x1x1xf32>
    %52 = arith.addf %50, %51 : vector<1x1x1xf32>
    %c0_16 = arith.constant 0 : index
    %c0_17 = arith.constant 0 : index
    %c0_18 = arith.constant 0 : index
    %53 = vector.load %arg4[%c0_16, %c0_17, %c0_18] : memref<1x1x1xf32, #tpu.memory_space<vmem>>, vector<1x1x1xf32>
    tpu.vector_store %arg4[%c0_16, %c0_17, %c0_18], %52 {strides = array<i32>} : memref<1x1x1xf32, #tpu.memory_space<vmem>>, vector<1x1x1xf32>,
    return
  }
  func.func @transform_0(%arg0: i32, %arg1: i32) -> (i32, i32) {
    %c2_i32 = arith.constant 2 : i32
    %0 = arith.muli %arg0, %c2_i32 : i32
    %1 = arith.addi %0, %arg1 : i32
    %c2_i32_0 = arith.constant 2 : i32
    %2 = arith.minsi %1, %c2_i32_0 : i32
    %c0_i32 = arith.constant 0 : i32
    %c0_i32_1 = arith.constant 0 : i32
    return %2, %c0_i32 : i32, i32
  }
  func.func @transform_1(%arg0: i32, %arg1: i32) -> (i32, i32) {
    %c2_i32 = arith.constant 2 : i32
    %0 = arith.muli %arg0, %c2_i32 : i32
    %1 = arith.addi %0, %arg1 : i32
    %c2_i32_0 = arith.constant 2 : i32
    %2 = arith.minsi %1, %c2_i32_0 : i32
    %c0_i32 = arith.constant 0 : i32
    %c0_i32_1 = arith.constant 0 : i32
    return %2, %c0_i32 : i32, i32
  }
  func.func @transform_2(%arg0: i32, %arg1: i32) -> (i32, i32, i32) {
    %c0_i32 = arith.constant 0 : i32
    %c0_i32_0 = arith.constant 0 : i32
    %c0_i32_1 = arith.constant 0 : i32
    return %arg0, %c0_i32, %c0_i32_0 : i32, i32, i32
  }
}

</mosaic_0001>

<bundles_post_ra>
// kernel: tpu_custom_call.1
= control target key start
LH: loop header
LB: loop body
LE: loop exit
PB: predicated region body
PF: predicated region fallthrough
CT: control target
= control target key end

     0   :  { %7 = vsyncpa [#allocation3], 0  ;;  %s3880_s0 = inlined_call_operand.hbm [shape: f32[320,320], index: 0, kind: input, shape index: {}]   ;;  %s3881_s1 = inlined_call_operand.hbm [shape: f32[320,320], index: 1, kind: input, shape index: {}]   ;;  %s3882_s2 = inlined_call_operand.vmem [shape: f32[2,1,1], index: 2, kind: output, shape index: {}]  }
   0x1   :  { %9 = vsyncpa [#allocation3 + $0x1], 0 }
   0x2   :  { %10 = vsyncpa [#allocation5], 0 }
   0x3   :  { %12 = vsyncpa [#allocation5 + $0x1], 0  ;;  %s2195_s9 = smov 0   ;;  %s2197_s10 = smov 0  }
   0x4   :  { %s2199_s11 = smov 0   ;;  %s2201_s12 = smov 0  }
   0x5   :  { %s2203_s13 = smov 0   ;;  %s2205_s14 = smov 0  }
   0x6   :  { %s2207_s15 = smov 0   ;;  %s2209_s16 = smov 0  }
   0x7 LB: > { %s27_s17 = sadd.s32 1, %s2163_s14  ;;  %s30_s18 = sadd.s32 1, %s2167_s15  ;;  %s2171_s16 = sphi %s2209_s16, %s18_s16   ;;  %s2167_s15 = sphi %s2207_s15, %s4252_s15   ;;  %s2163_s14 = sphi %s2205_s14, %s4251_s14   ;;  %s2159_s13 = sphi %s2203_s13, %s4250_s13   ;;  %s2155_s12 = sphi %s2201_s12, %s4249_s12   ;;  %s2151_s11 = sphi %s2199_s11, %s4248_s11   ;;  %s2147_s10 = sphi %s2197_s10, %s4247_s10   ;;  %s2143_s9 = sphi %s2195_s9, %s4246_s9  }
   0x8   : > { %p28_p0 = scmp.ge.s32.totalorder %s27_s17, 2  ;;  %s1628_s19 = sadd.s32 4294967295, %s2171_s16  }
   0x9   : > { %s1630_s20 = sshll.u32 %s2167_s15, 1  ;;  %p52_p1 = scmp.ne.s32.totalorder %s2151_s11, %s2147_s10 }
   0xa   : > { %s4254_s17 = smov (%p28_p0, %s27_s17), 0  ;;  %s4256_s18 = smov (!%p28_p0, %s30_s18), %s2167_s15 }
   0xb   : > { %s35_s21 = sadd.s32 %s2163_s14, %s1630_s20  ;;  %p32_p2 = scmp.ge.s32.totalorder %s4256_s18, 2 }
   0xc   : > { %p36_p3 = scmp.lt.s32.totalorder %s35_s21, 2  ;;  %p53_p4 = scmp.eq.s32.totalorder %s2171_s16, 0 }
   0xd   : > { %p58_p5 = scmp.ne.s32.totalorder %s2147_s10, %s2143_s9  ;;  %s4258_s18 = smov (%p32_p2, %s4256_s18), 0 }
   0xe   : > { %s4260_s21 = smov (!%p36_p3, %s35_s21), 2  ;;  %s1631_s22 = sshll.u32 %s4258_s18, 1 }
   0xf   : > { %p2250_p6 = por %p53_p4, %p52_p1  ;;  %s39_s24 = sadd.s32 %s1631_s22, %s4254_s17 }
  0x10   : > { %p59_p7 = scmp.eq.s32.totalorder %s1628_s19, 0  ;;  %p40_p8 = scmp.lt.s32.totalorder %s39_s24, 2 }
  0x11   : > { %s45_s27 = sadd.s32 1, %s2151_s11  ;;  %p1635_p11 = scmp.ge.s32.totalorder %s2171_s16, 4 }
  0x12   : > { %p2255_p9 = por %p59_p7, %p58_p5  ;;  %s4262_s24 = smov (!%p40_p8, %s39_s24), 2 }
  0x13   : > { %s42_s26 = ssub.s32 %s4260_s21, %s4262_s24  ;;  %138 = sbr.rel (%p1635_p11) target bundleno = 106 (0x6a), region = 16 }
  0x14   : > { %p43_p10 = scmp.eq.s32.totalorder %s42_s26, 0 }
  0x16   : > { %s2262_s28 = scalar_select %p43_p10, %s2151_s11, %s45_s27  }
  0x18   : > { %141 = sbr.rel (!%p2250_p6) target bundleno = 65 (0x41), region = 20  ;;  %s142_s29 = sand.u32 (%p2250_p6), 1, %s2151_s11  }
  0x19   : > { %s1637_s30 = sshll.u32 (%p2250_p6), %s4260_s21, 4  ;;  %s1658_s3 = smul.u32 (%p2250_p6), 384, %s142_s29 }
  0x1a   : > { %s152_s4 = ssub.s32 (%p2250_p6), 40, %s1637_s30  ;;  %s2269_s8 = scalar_lea.sflag (%p2250_p6), [#allocation3], %s142_s29 }
  0x1b   : > { %p153_p12 = scmp.lt.s32.totalorder (%p2250_p6), %s152_s4, 16  ;;  %s146_s9 = scalar_lea.vmem (%p2250_p6), [#allocation2], %s1658_s3 }
  0x1d   : > { %s4264_s4 = smov (!%p153_p12, %s152_s4), 16 }
  0x1e   : > { %s1639_s5 = smul.u32 24, %s4264_s4 }
  0x20   : > { %s157_s6 = ssub.s32 384, %s1639_s5 }
  0x21   : > { %s158_s7 = sshll.u32 %s157_s6, 4 }
  0x22   : > { %159 = vsyncadd %s2269_s8, %s158_s7  ;;  %p2272_p13 = scmp.ne.s32.totalorder %s1639_s5, 0  ;;  %s1659_s20 = smul.u32 384, %s4260_s21 }
  0x23   : > { %s2277_s22 = sshll.u32 %s146_s9, 4  ;;  %s2279_s24 = smul.u32 384, %s4264_s4  ;;  %s168_s22 = int_to_ptr.vmem [resolvable:$true] %s2277_s22 }
  0x24   : > { %s163_s29 = scalar_lea.hbm %s3880_s0, %s1659_s20  ;;  %s2034_s20 = scalar_lea.hbm %s3880_s0, 960 }
  0x25   : > { %s165_s30 = sshll.u32 %s163_s29, 4  ;;  %s2025_s5 = sshrl.u32 %s2279_s24, 4  ;;  %s2285_s30 = int_to_ptr.hbm [resolvable:$true] %s165_s30 }
  0x26   : > { %s2023_s3 = sshra.s32 %s2285_s30, 4  ;;  %s2061_s6 = sshll.u32 %s2025_s5, 4  ;;  %s2024_s3 = int_to_ptr.hbm [resolvable:$true] %s2023_s3 }
  0x27   : > { %p2027_p0 = scmp.ne.s32.totalorder %s2061_s6, %s2279_s24  ;;  %s2028_s7 = sadd.s32 1, %s2025_s5 }
  0x29   : > { %s4266_s7 = smov (!%p2027_p0, %s2028_s7), %s2025_s5 }
  0x2a   : > { %s2030_s4 = scalar_lea.hbm %s2024_s3, %s4266_s7 }
  0x2b   : > { %p2031_p1 = scmp.ne.s32.totalorder %s2024_s3, %s2030_s4  ;;  %p2036_p4 = scmp.lt.s32.totalorder %s2034_s20, %s2030_s4 }
  0x2d   : > { %p2032_p2 = pnand %p2031_p1, %p2272_p13 }
  0x2f   : > { %p2033_p3 = pneg %p2032_p2 }
  0x31   : > { %p2038_p5 = pnand %p2036_p4, %p2033_p3 }
  0x33   : > { %2041 = shalt.err (!%p2038_p5)
}
  0x34   : > { %s2042_s27 = sshra.s32 %s168_s22, 4  ;;  %s2173_s3 = smov [#allocation2]   ;;  %s2043_s27 = int_to_ptr.vmem [resolvable:$true] %s2042_s27 }
  0x35   : > { %s2049_s29 = scalar_lea.vmem %s2043_s27, %s4266_s7  ;;  %s2053_s5 = scalar_lea.vmem %s2173_s3, 768 }
  0x36   : > { %p2050_p7 = scmp.ne.s32.totalorder %s2043_s27, %s2049_s29  ;;  %p2055_p11 = scmp.lt.s32.totalorder %s2053_s5, %s2049_s29 }
  0x38   : > { %p2051_p8 = pnand %p2050_p7, %p2272_p13 }
  0x3a   : > { %p2052_p10 = pneg %p2051_p8 }
  0x3c   : > { %p2057_p12 = pnand %p2055_p11, %p2052_p10 }
  0x3e   : > { %2060 = shalt.err (!%p2057_p12)
}
  0x3f   : > { %s2174_s6 = smov 384   ;;  %s2175_s4 = smov 24  }
  0x40   : > { %173 = dma.hbm_to_vmem [thread:$0]  (%p2272_p13), %s2285_s30, %s2279_s24, %s168_s22, %s2269_s8, %s2174_s6, %s2174_s6, %s2175_s4  }
  0x41 PF: > { %176 = sbr.rel (!%p2250_p6) target bundleno = 106 (0x6a), region = 24  ;;  %s177_s7 = sand.u32 (%p2250_p6), 1, %s2151_s11  }
  0x42   : > { %s1645_s9 = sshll.u32 (%p2250_p6), %s4260_s21, 4  ;;  %s1660_s26 = smul.u32 (%p2250_p6), 384, %s177_s7 }
  0x43   : > { %s187_s20 = ssub.s32 (%p2250_p6), 40, %s1645_s9  ;;  %s2310_s5 = scalar_lea.sflag (%p2250_p6), [#allocation5], %s177_s7 }
  0x44   : > { %p188_p0 = scmp.lt.s32.totalorder (%p2250_p6), %s187_s20, 16  ;;  %s181_s19 = scalar_lea.vmem (%p2250_p6), [#allocation4], %s1660_s26 }
  0x46   : > { %s4268_s20 = smov (!%p188_p0, %s187_s20), 16 }
  0x47   : > { %s1647_s27 = smul.u32 24, %s4268_s20 }
  0x49   : > { %s192_s29 = ssub.s32 384, %s1647_s27 }
  0x4a   : > { %s193_s3 = sshll.u32 %s192_s29, 4 }
  0x4b   : > { %194 = vsyncadd %s2310_s5, %s193_s3  ;;  %p2313_p13 = scmp.ne.s32.totalorder %s1647_s27, 0  ;;  %s1661_s8 = smul.u32 384, %s4260_s21 }
  0x4c   : > { %s2318_s22 = sshll.u32 %s181_s19, 4  ;;  %s2320_s24 = smul.u32 384, %s4268_s20  ;;  %s203_s22 = int_to_ptr.vmem [resolvable:$true] %s2318_s22 }
  0x4d   : > { %s198_s4 = scalar_lea.hbm %s3881_s1, %s1661_s8  ;;  %s2073_s19 = scalar_lea.hbm %s3881_s1, 960 }
  0x4e   : > { %s200_s7 = sshll.u32 %s198_s4, 4  ;;  %s2064_s21 = sshrl.u32 %s2320_s24, 4  ;;  %s2326_s7 = int_to_ptr.hbm [resolvable:$true] %s200_s7 }
  0x4f   : > { %s2062_s9 = sshra.s32 %s2326_s7, 4  ;;  %s2100_s26 = sshll.u32 %s2064_s21, 4  ;;  %s2063_s9 = int_to_ptr.hbm [resolvable:$true] %s2062_s9 }
  0x50   : > { %p2066_p6 = scmp.ne.s32.totalorder %s2100_s26, %s2320_s24  ;;  %s2067_s27 = sadd.s32 1, %s2064_s21 }
  0x52   : > { %s4270_s27 = smov (!%p2066_p6, %s2067_s27), %s2064_s21 }
  0x53   : > { %s2069_s20 = scalar_lea.hbm %s2063_s9, %s4270_s27 }
  0x54   : > { %p2070_p1 = scmp.ne.s32.totalorder %s2063_s9, %s2069_s20  ;;  %p2075_p4 = scmp.lt.s32.totalorder %s2073_s19, %s2069_s20 }
  0x56   : > { %p2071_p2 = pnand %p2070_p1, %p2313_p13 }
  0x58   : > { %p2072_p3 = pneg %p2071_p2 }
  0x5a   : > { %p2077_p5 = pnand %p2075_p4, %p2072_p3 }
  0x5c   : > { %2080 = shalt.err (!%p2077_p5)
}
  0x5d   : > { %s2081_s8 = sshra.s32 %s203_s22, 4  ;;  %s2176_s6 = smov [#allocation4]   ;;  %s2082_s8 = int_to_ptr.vmem [resolvable:$true] %s2081_s8 }
  0x5e   : > { %s2088_s30 = scalar_lea.vmem %s2082_s8, %s4270_s27  ;;  %s2092_s4 = scalar_lea.vmem %s2176_s6, 768 }
  0x5f   : > { %p2089_p7 = scmp.ne.s32.totalorder %s2082_s8, %s2088_s30  ;;  %p2094_p11 = scmp.lt.s32.totalorder %s2092_s4, %s2088_s30 }
  0x61   : > { %p2090_p8 = pnand %p2089_p7, %p2313_p13 }
  0x63   : > { %p2091_p10 = pneg %p2090_p8 }
  0x65   : > { %p2096_p12 = pnand %p2094_p11, %p2091_p10 }
  0x67   : > { %2099 = shalt.err (!%p2096_p12)
}
  0x68   : > { %s2177_s9 = smov 384   ;;  %s2178_s21 = smov 24  }
  0x69   : > { %208 = dma.hbm_to_vmem [thread:$0]  (%p2313_p13), %s2326_s7, %s2320_s24, %s203_s22, %s2310_s5, %s2177_s9, %s2177_s9, %s2178_s21  }
  0x6a PF: > { %p1652_p0 = scmp.ge.s32.totalorder %s2171_s16, 1  ;;  %p210_p6 = scmp.lt.s32.totalorder %s2171_s16, 5 }
  0x6c   : > { %p211_p1 = pnand %p1652_p0, %p210_p6 }
  0x6e   : > { %214 = sbr.rel (%p211_p1) target bundleno = 640 (0x280), region = 28 }
  0x73   : > { %s216_s26 = sand.u32 1, %s2147_s10  }
  0x74   : > { %s1662_s27 = smul.u32 384, %s216_s26  ;;  %s217_s20 = scalar_lea.sflag [#allocation3], %s216_s26 }
  0x76   : > { %s2350_s29 = scalar_lea.vmem [#allocation2], %s1662_s27 }
  0x77   : > { %2134 = dma.done.wait (%p2255_p9), %s217_s20, 6144  }
  0x78   : > { %2136 = vsyncadd (%p2255_p9), %s217_s20, 4294961152  ;;  %s227_s5 = scalar_lea.sflag [#allocation5], %s216_s26  ;;  %s2356_s23 = scalar_lea.vmem [#allocation4], %s1662_s27 }
  0x79   : > { %2138 = dma.done.wait (%p2255_p9), %s227_s5, 6144  }
  0x7a   : > { %2140 = vsyncadd (%p2255_p9), %s227_s5, 4294961152  ;;  %p275_p13 = scmp.lt.s32.totalorder %s2159_s13, 1  ;;  %s1653_s22 = sshll.u32 %s2159_s13, 1 }
  0x7b   : > { %s2365_s24 = sadd.s32 %s2155_s12, %s1653_s22  ;;  %p1655_p2 = scmp.ne.s32.totalorder %s2155_s12, 0 }
  0x7c   : > { %s4272_s13 = smov (!%p275_p13, %s2159_s13), 1  ;;  %s1654_s7 = sshll.u32 %s2365_s24, 7 }
  0x7d   : > { %s2372_s8 = scalar_lea.vmem %s3882_s2, %s4272_s13  ;;  %284 = sbr.rel (%p1655_p2) target bundleno = 132 (0x84), region = 40 }
  0x82   : > { %vm285_vm0 = vcmask 0   ;;  %v2179_v0 = vmov 0.0  }
  0x83   : > { %286 = vst.msk [vmem:[%s2372_s8] sm:$0x1] %vm285_vm0, %v2179_v0 }
  0x84 PF: > { %v2377_v1 = vld [vmem:[%s2350_s29 + $0x60] sm:$0xff]  ;;  %v2380_v2 = vld [vmem:[%s2350_s29 + $0x68] sm:$0xff]  ;;  %v2383_v3 = vld [vmem:[%s2350_s29 + $0x70] sm:$0xff]  ;;  %vm486_vm1 = vcmask 523264   ;;  %v383_v42 = vlaneseq }
  0x85   : > { %v506_v4 = vmax.f32 %v2377_v1, %v2380_v2  ;;  %v507_v5 = vsel %vm486_vm1, %v2383_v3, -inf  ;;  %v2390_v6 = vld [vmem:[%s2350_s29 + $0x30] sm:$0xff]  ;;  %v2393_v7 = vld [vmem:[%s2350_s29 + $0x38] sm:$0xff]  ;;  %v2396_v8 = vld [vmem:[%s2350_s29 + $0x40] sm:$0xff] }
  0x86   : > { %4016 = vst [vmem:[#allocation8_spill] sm:$0xff] %v2393_v7  ;;  %v496_v9 = vmax.f32 %v2390_v6, %v2393_v7  ;;  %v497_v10 = vsel %vm486_vm1, %v2396_v8, -inf  ;;  %v2403_v11 = vld [vmem:[%s2350_s29] sm:$0xff]  ;;  %v2406_v12 = vld [vmem:[%s2350_s29 + $0x8] sm:$0xff]  ;;  %v2409_v13 = vld [vmem:[%s2350_s29 + $0x10] sm:$0xff]  ;;  %v2491_v52 = vshrl.u32 %v383_v42, 7 }
  0x87   : > { %v508_v14 = vmax.f32 %v506_v4, %v507_v5  ;;  %v485_v15 = vmax.f32 %v2403_v11, %v2406_v12  ;;  %v487_v16 = vsel %vm486_vm1, %v2409_v13, -inf  ;;  %v2416_v17 = vld [vmem:[%s2350_s29 + $0x78] sm:$0xff]  ;;  %v2419_v18 = vld [vmem:[%s2350_s29 + $0x80] sm:$0xff]  ;;  %v2422_v19 = vld [vmem:[%s2350_s29 + $0x88] sm:$0xff]  ;;  %v2511_v63 = vand.u32 127, %v383_v42 }
  0x88   : > { %v498_v20 = vmax.f32 %v496_v9, %v497_v10  ;;  %v2425_v21 = vld [vmem:[%s2350_s29 + $0x48] sm:$0xff]  ;;  %v2428_v22 = vld [vmem:[%s2350_s29 + $0x50] sm:$0xff]  ;;  %v2431_v23 = vld [vmem:[%s2350_s29 + $0x58] sm:$0xff]  ;;  %v511_v25 = vmax.f32 %v2416_v17, %v2419_v18  ;;  %v512_v29 = vsel %vm486_vm1, %v2422_v19, -inf  ;;  %v386_v62 = vadd.s32 16, %v2491_v52 }
  0x89   : > { %509 = vmax.xlane.f32.xlu2 %v508_v14  ;;  %v488_v24 = vmax.f32 %v485_v15, %v487_v16  ;;  %v2436_v26 = vld [vmem:[%s2350_s29 + $0x18] sm:$0xff]  ;;  %v2439_v27 = vld [vmem:[%s2350_s29 + $0x20] sm:$0xff]  ;;  %v2442_v28 = vld [vmem:[%s2350_s29 + $0x28] sm:$0xff]  ;;  %v501_v30 = vmax.f32 %v2425_v21, %v2428_v22  ;;  %v502_v31 = vsel %vm486_vm1, %v2431_v23, -inf  ;;  %v2524_v9 = vstv %s1654_s7 }
  0x8a   : > { %499 = vmax.xlane.f32.xlu1 %v498_v20  ;;  %v491_v32 = vmax.f32 %v2436_v26, %v2439_v27  ;;  %v492_v33 = vsel %vm486_vm1, %v2442_v28, -inf  ;;  %v513_v34 = vmax.f32 %v511_v25, %v512_v29  ;;  %v2455_v36 = vld [vmem:[%s2350_s29 + $0xc0] sm:$0xff]  ;;  %v2458_v37 = vld [vmem:[%s2350_s29 + $0xc8] sm:$0xff]  ;;  %v2461_v39 = vld [vmem:[%s2350_s29 + $0xd0] sm:$0xff]  ;;  %4018 = vst [vmem:[#allocation10_spill] sm:$0xff] %v2524_v9  ;;  %v2540_v25 = vadd.s32 %v2524_v9, %v386_v62 }
  0x8b   : > { %489 = vmax.xlane.f32.xlu0 %v488_v24  ;;  %v503_v35 = vmax.f32 %v501_v30, %v502_v31  ;;  %v2464_v40 = vld [vmem:[%s2350_s29 + $0xa8] sm:$0xff]  ;;  %v2467_v41 = vld [vmem:[%s2350_s29 + $0xb0] sm:$0xff]  ;;  %v2470_v43 = vld [vmem:[%s2350_s29 + $0xb8] sm:$0xff]  ;;  %v526_v46 = vmax.f32 %v2455_v36, %v2458_v37  ;;  %v527_v48 = vsel %vm486_vm1, %v2461_v39, -inf  ;;  %v2543_v29 = vadd.s32 128, %v2511_v63 }
  0x8c   : > { %v493_v38 = vmax.f32 %v491_v32, %v492_v33  ;;  %v2473_v44 = vld [vmem:[%s2350_s29 + $0x90] sm:$0xff]  ;;  %v2476_v45 = vld [vmem:[%s2350_s29 + $0x98] sm:$0xff]  ;;  %v2481_v47 = vld [vmem:[%s2350_s29 + $0xa0] sm:$0xff]  ;;  %v521_v49 = vmax.f32 %v2464_v40, %v2467_v41  ;;  %v522_v50 = vsel %vm486_vm1, %v2470_v43, -inf  ;;  %4019 = vst [vmem:[#allocation11_spill] sm:$0xff] %v2540_v25  ;;  %vm3925_vm2 = vcmp.eq.s32.totalorder %v2540_v25, %v2511_v63 }
  0x8d   : > { %4017 = vst [vmem:[#allocation9_spill] sm:$0xff] %v2476_v45  ;;  %v516_v51 = vmax.f32 %v2473_v44, %v2476_v45  ;;  %v517_v53 = vsel %vm486_vm1, %v2481_v47, -inf  ;;  %v528_v54 = vmax.f32 %v526_v46, %v527_v48  ;;  %v2496_v56 = vld [vmem:[%s2350_s29 + $0x108] sm:$0xff]  ;;  %v2499_v57 = vld [vmem:[%s2350_s29 + $0x110] sm:$0xff]  ;;  %v2502_v59 = vld [vmem:[%s2350_s29 + $0x118] sm:$0xff]  ;;  %vm3924_vm3 = vcmp.eq.s32.totalorder %v2540_v25, %v2543_v29 }
  0x8e   : > { %v523_v55 = vmax.f32 %v521_v49, %v522_v50  ;;  %v2505_v60 = vld [vmem:[%s2350_s29 + $0xf0] sm:$0xff]  ;;  %v2508_v61 = vld [vmem:[%s2350_s29 + $0xf8] sm:$0xff]  ;;  %v2514_v0 = vld [vmem:[%s2350_s29 + $0x100] sm:$0xff]  ;;  %v541_v10 = vmax.f32 %v2496_v56, %v2499_v57  ;;  %v542_v15 = vsel %vm486_vm1, %v2502_v59, -inf  ;;  %v2570_v49 = vadd.s32 %v2524_v9, %v2491_v52 }
  0x8f   : > { %v518_v58 = vmax.f32 %v516_v51, %v517_v53  ;;  %v2517_v4 = vld [vmem:[%s2350_s29 + $0xd8] sm:$0xff]  ;;  %v2520_v5 = vld [vmem:[%s2350_s29 + $0xe0] sm:$0xff]  ;;  %v2529_v14 = vld [vmem:[%s2350_s29 + $0xe8] sm:$0xff]  ;;  %v536_v16 = vmax.f32 %v2505_v60, %v2508_v61  ;;  %v537_v20 = vsel %vm486_vm1, %v2514_v0, -inf }
  0x90   : > { %v531_v24 = vmax.f32 %v2517_v4, %v2520_v5  ;;  %v532_v30 = vsel %vm486_vm1, %v2529_v14, -inf  ;;  %v543_v31 = vmax.f32 %v541_v10, %v542_v15  ;;  %v2548_v32 = vld [vmem:[%s2350_s29 + $0x150] sm:$0xff]  ;;  %v2551_v33 = vld [vmem:[%s2350_s29 + $0x158] sm:$0xff]  ;;  %v2563_v46 = vld [vmem:[%s2350_s29 + $0x140] sm:$0xff]  ;;  %4026 = vst [vmem:[#allocation18_spill] sm:$0xff] %v2570_v49  ;;  %vm421_vm5 = vcmp.eq.s32.totalorder %v2570_v49, %v2511_v63 }
  0x91   : > { %514 = vmax.xlane.f32.xlu2 %v513_v34  ;;  %4020 = vst [vmem:[#allocation12_spill] sm:$0xff] %v2548_v32  ;;  %v2554_v34 = vld [vmem:[%s2350_s29 + $0x160] sm:$0xff]  ;;  %v2560_v42 = vld [vmem:[%s2350_s29 + $0x138] sm:$0xff]  ;;  %v2566_v48 = vld [vmem:[%s2350_s29 + $0x148] sm:$0xff]  ;;  %vm422_vm6 = vcmp.eq.s32.totalorder %v2570_v49, %v2543_v29 }
  0x92   : > { %504 = vmax.xlane.f32.xlu1 %v503_v35  ;;  %4021 = vst [vmem:[#allocation13_spill] sm:$0xff] %v2551_v33  ;;  %v2557_v35 = vadd.s32 256, %v2511_v63  ;;  %v533_v50 = vmax.f32 %v531_v24, %v532_v30  ;;  %v2573_v51 = vld [vmem:[%s2350_s29 + $0x120] sm:$0xff]  ;;  %v2576_v53 = vld [vmem:[%s2350_s29 + $0x128] sm:$0xff]  ;;  %v557_v62 = vsel %vm486_vm1, %v2554_v34, -inf  ;;  %v551_v10 = vmax.f32 %v2560_v42, %v2563_v46 }
  0x93   : > { %494 = vmax.xlane.f32.xlu0 %v493_v38  ;;  %4022 = vst [vmem:[#allocation14_spill] sm:$0xff] %v2554_v34  ;;  %v538_v38 = vmax.f32 %v536_v16, %v537_v20  ;;  %v552_v15 = vsel %vm486_vm1, %v2566_v48, -inf  ;;  %v546_v16 = vmax.f32 %v2573_v51, %v2576_v53  ;;  %v844_v24 = vsel %vm3925_vm2, %v2390_v6, 0.0 }
  0x94   : > { %4023 = vst [vmem:[#allocation15_spill] sm:$0xff] %v2560_v42  ;;  %vm3907_vm4 = vcmp.eq.s32.totalorder %v2540_v25, %v2557_v35  ;;  %v845_v30 = vsel %vm3924_vm3, %v2393_v7, 0.0  ;;  %vm423_vm7 = vcmp.eq.s32.totalorder %v2570_v49, %v2557_v35  ;;  %v553_v42 = vmax.f32 %v551_v10, %v552_v15  ;;  %v2632_v7 = vld [vmem:[%s2350_s29 + $0x168] sm:$0xff] }
  0x95   : > { %4024 = vst [vmem:[#allocation16_spill] sm:$0xff] %v2563_v46  ;;  %v840_v10 = vsel %vm423_vm7, %v2409_v13, 0.0  ;;  %v390_v49 = vadd.s32 48, %v2491_v52 }
  0x96   : > { %4025 = vst [vmem:[#allocation17_spill] sm:$0xff] %v2566_v48  ;;  %v385_v48 = vadd.s32 8, %v2491_v52 }
  0x97   : > { %4028 = vst [vmem:[#allocation20_spill] sm:$0xff] %v2632_v7 }
  0x99   : > { %529 = vmax.xlane.f32.xlu2 %v528_v54  ;;  %v2579_v54 = vld [vmem:[%s2350_s29 + $0x130] sm:$0xff] }
  0x9a   : > { %524 = vmax.xlane.f32.xlu1 %v523_v55  ;;  %v387_v55 = vadd.s32 24, %v2491_v52  ;;  %v547_v20 = vsel %vm486_vm1, %v2579_v54, -inf }
  0x9b   : > { %519 = vmax.xlane.f32.xlu0 %v518_v58  ;;  %v556_v58 = vmax.f32 %v2548_v32, %v2551_v33  ;;  %v548_v34 = vmax.f32 %v546_v16, %v547_v20  ;;  %v896_v33 = vadd.f32 %v845_v30, %v844_v24  ;;  %v839_v32 = vsel %vm422_vm6, %v2406_v12, 0.0 }
  0x9c   : > { %v2655_v20 = vadd.s32 %v2524_v9, %v385_v48  ;;  %v392_v24 = vadd.s32 64, %v2491_v52 }
  0x9d   : > { %v558_v46 = vmax.f32 %v556_v58, %v557_v62  ;;  %v2635_v58 = vld [vmem:[%s2350_s29 + $0x170] sm:$0xff]  ;;  %v2638_v62 = vld [vmem:[%s2350_s29 + $0x178] sm:$0xff] }
  0x9e   : > { %4029 = vst [vmem:[#allocation21_spill] sm:$0xff] %v2635_v58  ;;  %v562_v25 = vsel %vm486_vm1, %v2638_v62, -inf  ;;  %vm424_vm14 = vcmp.eq.s32.totalorder %v2655_v20, %v2511_v63  ;;  %vm425_vm15 = vcmp.eq.s32.totalorder %v2655_v20, %v2543_v29  ;;  %vm426_vm0 = vcmp.eq.s32.totalorder %v2655_v20, %v2557_v35 }
  0x9f   : > { %4030 = vst [vmem:[#allocation22_spill] sm:$0xff] %v2638_v62 }
  0xa0   : > { %4032 = vst [vmem:[#allocation24_spill] sm:$0xff] %v2655_v20 }
  0xa1   : > { %544 = vmax.xlane.f32.xlu2 %v543_v31  ;;  %v389_v31 = vadd.s32 40, %v2491_v52 }
  0xa2   : > { %539 = vmax.xlane.f32.xlu1 %v538_v38  ;;  %v2614_v38 = vadd.s32 %v2524_v9, %v387_v55  ;;  %v838_v55 = vsel %vm421_vm5, %v2403_v11, 0.0 }
  0xa3   : > { %534 = vmax.xlane.f32.xlu0 %v533_v50  ;;  %v846_v50 = vsel %vm3907_vm4, %v2396_v8, 0.0  ;;  %v2645_v15 = vadd.s32 %v2524_v9, %v389_v31  ;;  %v886_v30 = vadd.f32 %v839_v32, %v838_v55  ;;  %v561_v31 = vmax.f32 %v2632_v7, %v2635_v58 }
  0xa4   : > { %4027 = vst [vmem:[#allocation19_spill] sm:$0xff] %v2614_v38  ;;  %vm3906_vm8 = vcmp.eq.s32.totalorder %v2614_v38, %v2511_v63  ;;  %vm3905_vm9 = vcmp.eq.s32.totalorder %v2614_v38, %v2543_v29  ;;  %v897_v16 = vsel %vm486_vm1, %v846_v50, 0.0  ;;  %vm3904_vm10 = vcmp.eq.s32.totalorder %v2614_v38, %v2557_v35 }
  0xa5   : > { %4031 = vst [vmem:[#allocation23_spill] sm:$0xff] %v2645_v15  ;;  %v887_v50 = vsel %vm486_vm1, %v840_v10, 0.0  ;;  %v847_v48 = vsel %vm3906_vm8, %v2425_v21, 0.0  ;;  %v848_v32 = vsel %vm3905_vm9, %v2428_v22, 0.0  ;;  %vm3901_vm11 = vcmp.eq.s32.totalorder %v2645_v15, %v2511_v63 }
  0xa6   : > { %vm3900_vm12 = vcmp.eq.s32.totalorder %v2645_v15, %v2543_v29  ;;  %vm3899_vm13 = vcmp.eq.s32.totalorder %v2645_v15, %v2557_v35  ;;  %v898_v55 = vadd.f32 %v897_v16, %v896_v33  ;;  %v888_v10 = vadd.f32 %v887_v50, %v886_v30 }
  0xa7   : > { %v901_v62 = vadd.f32 %v848_v32, %v847_v48  ;;  %v2693_v58 = vadd.s32 %v2524_v9, %v390_v49  ;;  %v853_v38 = vsel %vm3901_vm11, %v2416_v17, 0.0  ;;  %v854_v7 = vsel %vm3900_vm12, %v2419_v18, 0.0 }
  0xa8   : > { %v855_v33 = vsel %vm3899_vm13, %v2422_v19, 0.0  ;;  %v841_v49 = vsel %vm424_vm14, %v2436_v26, 0.0  ;;  %v842_v30 = vsel %vm425_vm15, %v2439_v27, 0.0  ;;  %v843_v50 = vsel %vm426_vm0, %v2442_v28, 0.0 }
  0xa9   : > { %559 = vmax.xlane.f32.xlu2 %v558_v46  ;;  %v388_v46 = vadd.s32 32, %v2491_v52  ;;  %4034 = vst [vmem:[#allocation26_spill] sm:$0xff] %v2693_v58  ;;  %v912_v48 = vsel %vm486_vm1, %v855_v33, 0.0  ;;  %v892_v15 = vsel %vm486_vm1, %v843_v50, 0.0  ;;  %vm3919_vm9 = vcmp.eq.s32.totalorder %v2693_v58, %v2543_v29 }
  0xaa   : > { %554 = vmax.xlane.f32.xlu1 %v553_v42  ;;  %v849_v42 = vsel %vm3904_vm10, %v2431_v23, 0.0  ;;  %vm3920_vm10 = vcmp.eq.s32.totalorder %v2693_v58, %v2511_v63  ;;  %vm3918_vm8 = vcmp.eq.s32.totalorder %v2693_v58, %v2557_v35  ;;  %v857_v33 = vsel %vm3919_vm9, %v2476_v45, 0.0 }
  0xab   : > { %549 = vmax.xlane.f32.xlu0 %v548_v34  ;;  %v2690_v34 = vadd.s32 %v2524_v9, %v392_v24  ;;  %v902_v16 = vsel %vm486_vm1, %v849_v42, 0.0  ;;  %v563_v24 = vmax.f32 %v561_v31, %v562_v25  ;;  %v2725_v25 = vadd.s32 %v2524_v9, %v388_v46 }
  0xac   : > { %v911_v31 = vadd.f32 %v854_v7, %v853_v38  ;;  %v903_v32 = vadd.f32 %v902_v16, %v901_v62  ;;  %v891_v42 = vadd.f32 %v842_v30, %v841_v49  ;;  %v393_v62 = vadd.s32 72, %v2491_v52 }
  0xad   : > { %4033 = vst [vmem:[#allocation25_spill] sm:$0xff] %v2690_v34  ;;  %vm3908_vm13 = vcmp.eq.s32.totalorder %v2690_v34, %v2511_v63  ;;  %vm3917_vm12 = vcmp.eq.s32.totalorder %v2690_v34, %v2543_v29  ;;  %vm3909_vm11 = vcmp.eq.s32.totalorder %v2690_v34, %v2557_v35  ;;  %vm3923_vm4 = vcmp.eq.s32.totalorder %v2725_v25, %v2511_v63 }
  0xae   : > { %4035 = vst [vmem:[#allocation27_spill] sm:$0xff] %v2725_v25  ;;  %v862_v7 = vsel %vm3908_vm13, %v2455_v36, 0.0  ;;  %v863_v38 = vsel %vm3917_vm12, %v2458_v37, 0.0  ;;  %v864_v46 = vsel %vm3909_vm11, %v2461_v39, 0.0  ;;  %vm3922_vm13 = vcmp.eq.s32.totalorder %v2725_v25, %v2543_v29 }
  0xaf   : > { %vm3921_vm11 = vcmp.eq.s32.totalorder %v2725_v25, %v2557_v35  ;;  %v391_v16 = vadd.s32 56, %v2491_v52  ;;  %v893_v49 = vadd.f32 %v892_v15, %v891_v42  ;;  %v926_v30 = vadd.f32 %v863_v38, %v862_v7  ;;  %v2950_v25 = vld [vmem:[%s2356_s23 + $0x78] sm:$0xff] }
  0xb0   : > { %v858_v50 = vsel %vm3918_vm8, %v2481_v47, 0.0  ;;  %v927_v34 = vsel %vm486_vm1, %v864_v46, 0.0  ;;  %v850_v20 = vsel %vm3923_vm4, %v2377_v1, 0.0  ;;  %v851_v45 = vsel %vm3922_vm13, %v2380_v2, 0.0  ;;  %4050 = vst [vmem:[#allocation42_spill] sm:$0xff] %v2950_v25 }
  0xb1   : > { %889 = vadd.xlane.f32.xlu2 %v888_v10  ;;  %v856_v10 = vsel %vm3920_vm10, %v2473_v44, 0.0  ;;  %v2780_v15 = vadd.s32 %v2524_v9, %v393_v62  ;;  %v917_v7 = vsel %vm486_vm1, %v858_v50, 0.0  ;;  %v2791_v38 = vadd.s32 %v2524_v9, %v391_v16 }
  0xb2   : > { %899 = vadd.xlane.f32.xlu1 %v898_v55  ;;  %v395_v55 = vadd.s32 88, %v2491_v52  ;;  %v928_v46 = vadd.f32 %v927_v34, %v926_v30  ;;  %v906_v58 = vadd.f32 %v851_v45, %v850_v20  ;;  %v394_v45 = vadd.s32 80, %v2491_v52 }
  0xb3   : > { %564 = vmax.xlane.f32.xlu0 %v563_v24  ;;  %v913_v24 = vadd.f32 %v912_v48, %v911_v31  ;;  %4036 = vst [vmem:[#allocation28_spill] sm:$0xff] %v2780_v15  ;;  %v916_v31 = vadd.f32 %v857_v33, %v856_v10  ;;  %v852_v48 = vsel %vm3921_vm11, %v2383_v3, 0.0  ;;  %vm3935_vm12 = vcmp.eq.s32.totalorder %v2780_v15, %v2511_v63 }
  0xb4   : > { %v2787_v42 = vadd.s32 %v2524_v9, %v395_v55  ;;  %4038 = vst [vmem:[#allocation30_spill] sm:$0xff] %v2791_v38  ;;  %v907_v62 = vsel %vm486_vm1, %v852_v48, 0.0  ;;  %vm3934_vm8 = vcmp.eq.s32.totalorder %v2780_v15, %v2543_v29  ;;  %v396_v55 = vadd.s32 96, %v2491_v52 }
  0xb5   : > { %vm3933_vm11 = vcmp.eq.s32.totalorder %v2780_v15, %v2557_v35  ;;  %vm442_vm4 = vcmp.eq.s32.totalorder %v2791_v38, %v2511_v63  ;;  %vm443_vm3 = vcmp.eq.s32.totalorder %v2791_v38, %v2543_v29  ;;  %v908_v20 = vadd.f32 %v907_v62, %v906_v58 }
  0xb6   : > { %4037 = vst [vmem:[#allocation29_spill] sm:$0xff] %v2787_v42  ;;  %vm3932_vm9 = vcmp.eq.s32.totalorder %v2787_v42, %v2511_v63  ;;  %vm3931_vm10 = vcmp.eq.s32.totalorder %v2787_v42, %v2543_v29  ;;  %vm3930_vm13 = vcmp.eq.s32.totalorder %v2787_v42, %v2557_v35  ;;  %v865_v34 = vsel %vm3935_vm12, %v2517_v4, 0.0 }
  0xb7   : > { %v866_v10 = vsel %vm3934_vm8, %v2520_v5, 0.0  ;;  %vm444_vm2 = vcmp.eq.s32.totalorder %v2791_v38, %v2557_v35  ;;  %v871_v33 = vsel %vm3932_vm9, %v2496_v56, 0.0  ;;  %v872_v58 = vsel %vm3931_vm10, %v2499_v57, 0.0  ;;  %v2920_v38 = vld [vmem:[%s2356_s23 + $0x68] sm:$0xff] }
  0xb8   : > { %v867_v16 = vsel %vm3933_vm11, %v2529_v14, 0.0  ;;  %v859_v30 = vsel %vm442_vm4, %v2464_v40, 0.0  ;;  %v860_v50 = vsel %vm443_vm3, %v2467_v41, 0.0  ;;  %v861_v48 = vsel %vm444_vm2, %v2470_v43, 0.0  ;;  %4044 = vst [vmem:[#allocation36_spill] sm:$0xff] %v2920_v38 }
  0xb9   : > { %904 = vadd.xlane.f32.xlu2 %v903_v32  ;;  %v918_v32 = vadd.f32 %v917_v7, %v916_v31  ;;  %v931_v31 = vadd.f32 %v866_v10, %v865_v34  ;;  %v2854_v7 = vadd.s32 %v2524_v9, %v394_v45  ;;  %v941_v62 = vadd.f32 %v872_v58, %v871_v33  ;;  %v2880_v33 = vld [vmem:[%s2356_s23 + $0x18] sm:$0xff]  ;;  %v2883_v58 = vld [vmem:[%s2356_s23 + $0x20] sm:$0xff] }
  0xba   : > { %914 = vadd.xlane.f32.xlu1 %v913_v24  ;;  %v2835_v24 = vadd.s32 %v2524_v9, %v396_v55  ;;  %v932_v55 = vsel %vm486_vm1, %v867_v16, 0.0  ;;  %v921_v15 = vadd.f32 %v860_v50, %v859_v30  ;;  %v2890_v16 = vld [vmem:[%s2356_s23 + $0x28] sm:$0xff] }
  0xbb   : > { %894 = vadd.xlane.f32.xlu0 %v893_v49  ;;  %v873_v49 = vsel %vm3930_vm13, %v2502_v59, 0.0  ;;  %4040 = vst [vmem:[#allocation32_spill] sm:$0xff] %v2854_v7  ;;  %vm451_vm11 = vcmp.eq.s32.totalorder %v2854_v7, %v2511_v63  ;;  %vm3978_vm8 = vcmp.eq.s32.totalorder %v2854_v7, %v2543_v29  ;;  %vm3977_vm12 = vcmp.eq.s32.totalorder %v2854_v7, %v2557_v35  ;;  %v2917_v7 = vld [vmem:[%s2356_s23 + $0x60] sm:$0xff] }
  0xbc   : > { %4039 = vst [vmem:[#allocation31_spill] sm:$0xff] %v2835_v24  ;;  %v942_v42 = vsel %vm486_vm1, %v873_v49, 0.0  ;;  %vm3974_vm13 = vcmp.eq.s32.totalorder %v2835_v24, %v2511_v63  ;;  %vm3972_vm10 = vcmp.eq.s32.totalorder %v2835_v24, %v2543_v29  ;;  %vm3971_vm9 = vcmp.eq.s32.totalorder %v2835_v24, %v2557_v35 }
  0xbd   : > { %v943_v45 = vadd.f32 %v942_v42, %v941_v62  ;;  %v875_v34 = vsel %vm3972_vm10, %v2576_v53, 0.0  ;;  %v876_v42 = vsel %vm3971_vm9, %v2579_v54, 0.0  ;;  %v868_v49 = vsel %vm451_vm11, %v2505_v60, 0.0  ;;  %4043 = vst [vmem:[#allocation35_spill] sm:$0xff] %v2917_v7 }
  0xbe   : > { %v870_v50 = vsel %vm3977_vm12, %v2514_v0, 0.0  ;;  %v988_v62 = vsel %vm486_vm1, %v2890_v16, -inf }
  0xc1   : > { %919 = vadd.xlane.f32.xlu2 %v918_v32  ;;  %v922_v32 = vsel %vm486_vm1, %v861_v48, 0.0  ;;  %v947_v48 = vsel %vm486_vm1, %v876_v42, 0.0  ;;  %v2923_v42 = vld [vmem:[%s2356_s23 + $0x40] sm:$0xff] }
  0xc2   : > { %929 = vadd.xlane.f32.xlu1 %v928_v46  ;;  %v933_v46 = vadd.f32 %v932_v55, %v931_v31  ;;  %v923_v10 = vadd.f32 %v922_v32, %v921_v15  ;;  %v869_v15 = vsel %vm3978_vm8, %v2508_v61, 0.0  ;;  %v987_v31 = vmax.f32 %v2880_v33, %v2883_v58  ;;  %4045 = vst [vmem:[#allocation37_spill] sm:$0xff] %v2923_v42 }
  0xc3   : > { %909 = vadd.xlane.f32.xlu0 %v908_v20  ;;  %v874_v20 = vsel %vm3974_vm13, %v2573_v51, 0.0  ;;  %v936_v55 = vadd.f32 %v869_v15, %v868_v49  ;;  %v937_v32 = vsel %vm486_vm1, %v870_v50, 0.0  ;;  %v2929_v49 = vld [vmem:[%s2356_s23] sm:$0xff]  ;;  %v2932_v15 = vld [vmem:[%s2356_s23 + $0x8] sm:$0xff]  ;;  %v2937_v50 = vld [vmem:[%s2356_s23 + $0x10] sm:$0xff] }
  0xc4   : > { %v946_v30 = vadd.f32 %v875_v34, %v874_v20  ;;  %v989_v20 = vmax.f32 %v987_v31, %v988_v62  ;;  %v2911_v34 = vld [vmem:[%s2356_s23 + $0x30] sm:$0xff]  ;;  %4047 = vst [vmem:[#allocation39_spill] sm:$0xff] %v2929_v49  ;;  %v1002_v31 = vmax.f32 %v2917_v7, %v2920_v38  ;;  %v2953_v38 = vld [vmem:[%s2356_s23 + $0x80] sm:$0xff] }
  0xc5   : > { %4041 = vst [vmem:[#allocation33_spill] sm:$0xff] %v2911_v34  ;;  %v938_v24 = vadd.f32 %v937_v32, %v936_v55  ;;  %v982_v55 = vmax.f32 %v2929_v49, %v2932_v15  ;;  %v983_v32 = vsel %vm486_vm1, %v2937_v50, -inf  ;;  %v2992_v49 = vld [vmem:[%s2356_s23 + $0xc8] sm:$0xff] }
  0xc6   : > { %4048 = vst [vmem:[#allocation40_spill] sm:$0xff] %v2932_v15  ;;  %v2968_v15 = vld [vmem:[%s2356_s23 + $0x50] sm:$0xff] }
  0xc7   : > { %4049 = vst [vmem:[#allocation41_spill] sm:$0xff] %v2937_v50  ;;  %v984_v7 = vmax.f32 %v982_v55, %v983_v32  ;;  %v2971_v50 = vld [vmem:[%s2356_s23 + $0xb8] sm:$0xff] }
  0xc8   : > { %4051 = vst [vmem:[#allocation43_spill] sm:$0xff] %v2953_v38  ;;  %v1018_v32 = vsel %vm486_vm1, %v2971_v50, -inf }
  0xc9   : > { %934 = vadd.xlane.f32.xlu2 %v933_v46  ;;  %v948_v46 = vadd.f32 %v947_v48, %v946_v30  ;;  %v993_v48 = vsel %vm486_vm1, %v2923_v42, -inf  ;;  %v2962_v42 = vld [vmem:[%s2356_s23 + $0xb0] sm:$0xff]  ;;  %4055 = vst [vmem:[#allocation47_spill] sm:$0xff] %v2971_v50 }
  0xca   : > { %944 = vadd.xlane.f32.xlu1 %v943_v45  ;;  %v2914_v45 = vld [vmem:[%s2356_s23 + $0x38] sm:$0xff]  ;;  %4054 = vst [vmem:[#allocation46_spill] sm:$0xff] %v2962_v42 }
  0xcb   : > { %924 = vadd.xlane.f32.xlu0 %v923_v10  ;;  %4042 = vst [vmem:[#allocation34_spill] sm:$0xff] %v2914_v45  ;;  %v2926_v10 = vld [vmem:[%s2356_s23 + $0x70] sm:$0xff]  ;;  %v992_v30 = vmax.f32 %v2911_v34, %v2914_v45  ;;  %v2956_v45 = vld [vmem:[%s2356_s23 + $0x88] sm:$0xff] }
  0xcc   : > { %4046 = vst [vmem:[#allocation38_spill] sm:$0xff] %v2926_v10  ;;  %v1003_v62 = vsel %vm486_vm1, %v2926_v10, -inf  ;;  %v2965_v10 = vld [vmem:[%s2356_s23 + $0x48] sm:$0xff]  ;;  %v2995_v34 = vld [vmem:[%s2356_s23 + $0xd0] sm:$0xff] }
  0xcd   : > { %4052 = vst [vmem:[#allocation44_spill] sm:$0xff] %v2956_v45  ;;  %v997_v55 = vmax.f32 %v2965_v10, %v2968_v15 }
  0xce   : > { %4056 = vst [vmem:[#allocation48_spill] sm:$0xff] %v2995_v34 }
  0xd1   : > { %949 = vadd.xlane.f32.xlu2 %v948_v46  ;;  %v994_v46 = vmax.f32 %v992_v30, %v993_v48  ;;  %v1007_v30 = vmax.f32 %v2950_v25, %v2953_v38  ;;  %v1008_v48 = vsel %vm486_vm1, %v2956_v45, -inf }
  0xd2   : > { %990 = vmax.xlane.f32.xlu1 %v989_v20  ;;  %v1004_v20 = vmax.f32 %v1002_v31, %v1003_v62  ;;  %v2976_v31 = vld [vmem:[%s2356_s23 + $0x58] sm:$0xff] }
  0xd3   : > { %939 = vadd.xlane.f32.xlu0 %v938_v24  ;;  %v2959_v24 = vld [vmem:[%s2356_s23 + $0xa8] sm:$0xff]  ;;  %v1009_v38 = vmax.f32 %v1007_v30, %v1008_v48  ;;  %v1023_v30 = vsel %vm486_vm1, %v2995_v34, -inf }
  0xd4   : > { %4053 = vst [vmem:[#allocation45_spill] sm:$0xff] %v2959_v24  ;;  %v1017_v62 = vmax.f32 %v2959_v24, %v2962_v42  ;;  %v2998_v42 = vld [vmem:[%s2356_s23 + $0x90] sm:$0xff]  ;;  %v3004_v24 = vld [vmem:[%s2356_s23 + $0xa0] sm:$0xff] }
  0xd5   : > { %4058 = vst [vmem:[#allocation50_spill] sm:$0xff] %v3004_v24 }
  0xd6   : > { %v1019_v25 = vmax.f32 %v1017_v62, %v1018_v32  ;;  %v1013_v62 = vsel %vm486_vm1, %v3004_v24, -inf }
  0xd9   : > { %995 = vmax.xlane.f32.xlu2 %v994_v46  ;;  %v998_v46 = vsel %vm486_vm1, %v2976_v31, -inf }
  0xda   : > { %1005 = vmax.xlane.f32.xlu1 %v1004_v20  ;;  %v2989_v20 = vld [vmem:[%s2356_s23 + $0xc0] sm:$0xff]  ;;  %v999_v45 = vmax.f32 %v997_v55, %v998_v46 }
  0xdb   : > { %985 = vmax.xlane.f32.xlu0 %v984_v7  ;;  %v3001_v7 = vld [vmem:[%s2356_s23 + $0x98] sm:$0xff]  ;;  %v1022_v50 = vmax.f32 %v2989_v20, %v2992_v49 }
  0xdc   : > { %4057 = vst [vmem:[#allocation49_spill] sm:$0xff] %v3001_v7  ;;  %v1012_v48 = vmax.f32 %v2998_v42, %v3001_v7 }
  0xdd   : > { %v1024_v55 = vmax.f32 %v1022_v50, %v1023_v30  ;;  %v4061_v50 = vld [vmem:[#allocation8_spill] sm:$0xff] }
  0xde   : > { %v1014_v32 = vmax.f32 %v1012_v48, %v1013_v62 }
  0xe1   : > { %1010 = vmax.xlane.f32.xlu2 %v1009_v38 }
  0xe2   : > { %1020 = vmax.xlane.f32.xlu1 %v1019_v25 }
  0xe3   : > { %1000 = vmax.xlane.f32.xlu0 %v999_v45 }
  0xe9   : > { %1025 = vmax.xlane.f32.xlu2 %v1024_v55 }
  0xeb   : > { %1015 = vmax.xlane.f32.xlu0 %v1014_v32 }
  0xfc   : > { %v3014_v38 = vpop.xlane.xlu2 %509 }
  0xfd   : > { %4059 = vst [vmem:[#allocation51_spill] sm:$0xff] %v3014_v38  ;;  %v578_v46 = vsub.f32 %v2377_v1, %v3014_v38  ;;  %v579_v25 = vsub.f32 %v2380_v2, %v3014_v38  ;;  %v580_v45 = vsub.f32 %v2383_v3, %v3014_v38  ;;  %v3022_v34 = vpop.xlane.xlu1 %499 }
  0xfe   : > { %4060 = vst [vmem:[#allocation52_spill] sm:$0xff] %v3022_v34  ;;  %v572_v24 = vsub.f32 %v2390_v6, %v3022_v34  ;;  %v573_v30 = vsub.f32 %v4061_v50, %v3022_v34  ;;  %v574_v48 = vsub.f32 %v2396_v8, %v3022_v34  ;;  %v3030_v62 = vpop.xlane.xlu0 %489 }
  0xff   : > { %v638_v1 = vmul.f32 1.442695, %v578_v46  ;;  %v640_v55 = vmul.f32 1.442695, %v579_v25  ;;  %v642_v32 = vmul.f32 1.442695, %v580_v45  ;;  %v566_v2 = vsub.f32 %v2403_v11, %v3030_v62 }
 0x100   : > { %v626_v3 = vmul.f32 1.442695, %v572_v24  ;;  %v567_v38 = vsub.f32 %v2406_v12, %v3030_v62  ;;  %v628_v6 = vmul.f32 1.442695, %v573_v30  ;;  %v568_v50 = vsub.f32 %v2409_v13, %v3030_v62 }
 0x101   : > { %1734 = vpow2.f32 %v638_v1  ;;  %v630_v7 = vmul.f32 1.442695, %v574_v48  ;;  %v614_v8 = vmul.f32 1.442695, %v566_v2 }
 0x102   : > { %1736 = vpow2.f32 %v640_v55  ;;  %v616_v46 = vmul.f32 1.442695, %v567_v38  ;;  %v618_v25 = vmul.f32 1.442695, %v568_v50 }
 0x103   : > { %1738 = vpow2.f32 %v642_v32 }
 0x104   : > { %1740 = vpow2.f32 %v626_v3  ;;  %v3038_v45 = vpop.xlane.xlu2 %514 }
 0x105   : > { %4062 = vst [vmem:[#allocation8_spill] sm:$0xff] %v3038_v45  ;;  %1742 = vpow2.f32 %v628_v6  ;;  %v581_v11 = vsub.f32 %v2416_v17, %v3038_v45  ;;  %v582_v12 = vsub.f32 %v2419_v18, %v3038_v45  ;;  %v583_v24 = vsub.f32 %v2422_v19, %v3038_v45  ;;  %v3046_v13 = vpop.xlane.xlu1 %504 }
 0x106   : > { %4063 = vst [vmem:[#allocation53_spill] sm:$0xff] %v3046_v13  ;;  %1744 = vpow2.f32 %v630_v7  ;;  %v575_v30 = vsub.f32 %v2425_v21, %v3046_v13  ;;  %v576_v38 = vsub.f32 %v2428_v22, %v3046_v13  ;;  %v3052_v48 = vpop.xlane.xlu0 %494  ;;  %v577_v18 = vsub.f32 %v2431_v23, %v3046_v13 }
 0x107   : > { %v1735_v1 = vpop.eup %1734  ;;  %1746 = vpow2.f32 %v614_v8  ;;  %v644_v17 = vmul.f32 1.442695, %v581_v11  ;;  %v646_v55 = vmul.f32 1.442695, %v582_v12  ;;  %v648_v19 = vmul.f32 1.442695, %v583_v24 }
 0x108   : > { %v1737_v32 = vpop.eup %1736  ;;  %1748 = vpow2.f32 %v616_v46  ;;  %v632_v7 = vmul.f32 1.442695, %v575_v30  ;;  %v569_v21 = vsub.f32 %v2436_v26, %v3052_v48  ;;  %v570_v22 = vsub.f32 %v2439_v27, %v3052_v48 }
 0x109   : > { %v1739_v2 = vpop.eup %1738  ;;  %1750 = vpow2.f32 %v618_v25  ;;  %v634_v6 = vmul.f32 1.442695, %v576_v38  ;;  %v571_v50 = vsub.f32 %v2442_v28, %v3052_v48  ;;  %v636_v23 = vmul.f32 1.442695, %v577_v18 }
 0x10a   : > { %v1741_v3 = vpop.eup %1740  ;;  %1752 = vpow2.f32 %v644_v17  ;;  %v3062_v46 = vadd.f32 %v1737_v32, %v1735_v1  ;;  %v620_v25 = vmul.f32 1.442695, %v569_v21  ;;  %v622_v12 = vmul.f32 1.442695, %v570_v22 }
 0x10b   : > { %v1743_v8 = vpop.eup %1742  ;;  %1754 = vpow2.f32 %v646_v55  ;;  %v3067_v26 = vsel %vm486_vm1, %v1739_v2, 0.0  ;;  %v624_v55 = vmul.f32 1.442695, %v571_v50 }
 0x10c   : > { %v1745_v11 = vpop.eup %1744  ;;  %1756 = vpow2.f32 %v648_v19  ;;  %v3064_v24 = vpop.xlane.xlu2 %529  ;;  %v720_v32 = vadd.f32 %v1743_v8, %v1741_v3 }
 0x10d   : > { %4064 = vst [vmem:[#allocation54_spill] sm:$0xff] %v3064_v24  ;;  %v1747_v27 = vpop.eup %1746  ;;  %1758 = vpow2.f32 %v632_v7  ;;  %v590_v30 = vsub.f32 %v2455_v36, %v3064_v24  ;;  %v591_v28 = vsub.f32 %v2458_v37, %v3064_v24  ;;  %v592_v38 = vsub.f32 %v2461_v39, %v3064_v24  ;;  %v3075_v1 = vpop.xlane.xlu1 %524 }
 0x10e   : > { %4065 = vst [vmem:[#allocation55_spill] sm:$0xff] %v3075_v1  ;;  %v1749_v17 = vpop.eup %1748  ;;  %1760 = vpow2.f32 %v634_v6  ;;  %v587_v18 = vsub.f32 %v2464_v40, %v3075_v1  ;;  %v3079_v19 = vpop.xlane.xlu0 %519  ;;  %v588_v37 = vsub.f32 %v2467_v41, %v3075_v1  ;;  %v589_v39 = vsub.f32 %v2470_v43, %v3075_v1  ;;  %v4067_v43 = vld [vmem:[#allocation9_spill] sm:$0xff] }
 0x10f   : > { %4066 = vst [vmem:[#allocation56_spill] sm:$0xff] %v3079_v19  ;;  %v1751_v2 = vpop.eup %1750  ;;  %1762 = vpow2.f32 %v636_v23  ;;  %v662_v36 = vmul.f32 1.442695, %v590_v30  ;;  %v664_v21 = vmul.f32 1.442695, %v591_v28  ;;  %v721_v40 = vsel %vm486_vm1, %v1745_v11, 0.0 }
 0x110   : > { %v1753_v7 = vpop.eup %1752  ;;  %1764 = vpow2.f32 %v620_v25  ;;  %v666_v22 = vmul.f32 1.442695, %v592_v38  ;;  %v656_v6 = vmul.f32 1.442695, %v587_v18  ;;  %v710_v3 = vadd.f32 %v1749_v17, %v1747_v27 }
 0x111   : > { %v1755_v50 = vpop.eup %1754  ;;  %1766 = vpow2.f32 %v622_v12  ;;  %v711_v8 = vsel %vm486_vm1, %v1751_v2, 0.0  ;;  %v722_v30 = vadd.f32 %v721_v40, %v720_v32  ;;  %v584_v41 = vsub.f32 %v2473_v44, %v3079_v19 }
 0x112   : > { %v1757_v23 = vpop.eup %1756  ;;  %1768 = vpow2.f32 %v624_v55  ;;  %v585_v24 = vsub.f32 %v4067_v43, %v3079_v19  ;;  %v658_v28 = vmul.f32 1.442695, %v588_v37  ;;  %v712_v38 = vadd.f32 %v711_v8, %v710_v3 }
 0x113   : > { %v1759_v25 = vpop.eup %1758  ;;  %1770 = vpow2.f32 %v662_v36  ;;  %v586_v12 = vsub.f32 %v2481_v47, %v3079_v19  ;;  %v660_v27 = vmul.f32 1.442695, %v589_v39  ;;  %723 = vadd.xlane.f32.xlu0 %v722_v30  ;;  %v650_v17 = vmul.f32 1.442695, %v584_v41 }
 0x114   : > { %v1761_v11 = vpop.eup %1760  ;;  %1772 = vpow2.f32 %v664_v21  ;;  %v3093_v55 = vpop.xlane.xlu2 %544  ;;  %v735_v18 = vadd.f32 %v1755_v50, %v1753_v7  ;;  %713 = vadd.xlane.f32.xlu1 %v712_v38  ;;  %v652_v44 = vmul.f32 1.442695, %v585_v24  ;;  %v736_v21 = vsel %vm486_vm1, %v1757_v23, 0.0 }
 0x115   : > { %4068 = vst [vmem:[#allocation9_spill] sm:$0xff] %v3093_v55  ;;  %v1763_v32 = vpop.eup %1762  ;;  %1774 = vpow2.f32 %v666_v22  ;;  %v599_v2 = vsub.f32 %v2496_v56, %v3093_v55  ;;  %v600_v36 = vsub.f32 %v2499_v57, %v3093_v55  ;;  %v3099_v37 = vpop.xlane.xlu1 %539  ;;  %v601_v39 = vsub.f32 %v2502_v59, %v3093_v55 }
 0x116   : > { %4069 = vst [vmem:[#allocation57_spill] sm:$0xff] %v3099_v37  ;;  %v1765_v47 = vpop.eup %1764  ;;  %1776 = vpow2.f32 %v656_v6  ;;  %v596_v7 = vsub.f32 %v2505_v60, %v3099_v37  ;;  %v3106_v22 = vpop.xlane.xlu0 %534  ;;  %v654_v56 = vmul.f32 1.442695, %v586_v12  ;;  %v597_v57 = vsub.f32 %v2508_v61, %v3099_v37 }
 0x117   : > { %4070 = vst [vmem:[#allocation58_spill] sm:$0xff] %v3106_v22  ;;  %v1767_v24 = vpop.eup %1766  ;;  %1778 = vpow2.f32 %v658_v28  ;;  %v680_v50 = vmul.f32 1.442695, %v599_v2  ;;  %v682_v6 = vmul.f32 1.442695, %v600_v36  ;;  %v598_v59 = vsub.f32 %v2514_v0, %v3099_v37  ;;  %v3273_v37 = vld [vmem:[%s2356_s23 + $0x148] sm:$0xff] }
 0x118   : > { %v1769_v40 = vpop.eup %1768  ;;  %1780 = vpow2.f32 %v660_v27  ;;  %v684_v3 = vmul.f32 1.442695, %v601_v39  ;;  %v674_v60 = vmul.f32 1.442695, %v596_v7  ;;  %v737_v23 = vadd.f32 %v736_v21, %v735_v18  ;;  %v4072_v21 = vld [vmem:[#allocation13_spill] sm:$0xff] }
 0x119   : > { %v1771_v8 = vpop.eup %1770  ;;  %1782 = vpow2.f32 %v650_v17  ;;  %v725_v30 = vadd.f32 %v1761_v11, %v1759_v25  ;;  %v726_v43 = vsel %vm486_vm1, %v1763_v32, 0.0  ;;  %v715_v28 = vadd.f32 %v1767_v24, %v1765_v47 }
 0x11a   : > { %v1773_v41 = vpop.eup %1772  ;;  %1784 = vpow2.f32 %v652_v44  ;;  %v716_v38 = vsel %vm486_vm1, %v1769_v40, 0.0  ;;  %v593_v27 = vsub.f32 %v2517_v4, %v3106_v22  ;;  %v594_v0 = vsub.f32 %v2520_v5, %v3106_v22  ;;  %v4071_v4 = vld [vmem:[#allocation12_spill] sm:$0xff] }
 0x11b   : > { %v1775_v61 = vpop.eup %1774  ;;  %1786 = vpow2.f32 %v654_v56  ;;  %v727_v12 = vadd.f32 %v726_v43, %v725_v30  ;;  %v676_v25 = vmul.f32 1.442695, %v597_v57  ;;  %738 = vadd.xlane.f32.xlu0 %v737_v23  ;;  %v717_v11 = vadd.f32 %v716_v38, %v715_v28 }
 0x11c   : > { %v3118_v17 = vpop.eup %1776  ;;  %1788 = vpow2.f32 %v680_v50  ;;  %v595_v18 = vsub.f32 %v2529_v14, %v3106_v22  ;;  %v3122_v32 = vpop.xlane.xlu2 %559  ;;  %v678_v2 = vmul.f32 1.442695, %v598_v59  ;;  %v750_v5 = vadd.f32 %v1773_v41, %v1771_v8  ;;  %v4073_v14 = vld [vmem:[#allocation14_spill] sm:$0xff]  ;;  %v4076_v41 = vld [vmem:[#allocation16_spill] sm:$0xff] }
 0x11d   : > { %v1779_v44 = vpop.eup %1778  ;;  %1790 = vpow2.f32 %v682_v6  ;;  %728 = vadd.xlane.f32.xlu1 %v727_v12  ;;  %v608_v36 = vsub.f32 %v4071_v4, %v3122_v32  ;;  %v3126_v47 = vpop.xlane.xlu1 %554  ;;  %718 = vadd.xlane.f32.xlu2 %v717_v11  ;;  %v668_v7 = vmul.f32 1.442695, %v593_v27  ;;  %v609_v24 = vsub.f32 %v4072_v21, %v3122_v32  ;;  %v4075_v6 = vld [vmem:[#allocation15_spill] sm:$0xff] }
 0x11e   : > { %v1781_v39 = vpop.eup %1780  ;;  %1792 = vpow2.f32 %v684_v3  ;;  %v610_v56 = vsub.f32 %v4073_v14, %v3122_v32  ;;  %v3132_v50 = vpop.xlane.xlu0 %549  ;;  %v670_v40 = vmul.f32 1.442695, %v594_v0  ;;  %v605_v59 = vsub.f32 %v4075_v6, %v3126_v47  ;;  %v4077_v0 = vld [vmem:[#allocation17_spill] sm:$0xff] }
 0x11f   : > { %4074 = vst [vmem:[#allocation12_spill] sm:$0xff] %v3132_v50  ;;  %v1783_v57 = vpop.eup %1782  ;;  %1794 = vpow2.f32 %v674_v60  ;;  %v732_v8 = vadd.f32 %v3067_v26, %v3062_v46  ;;  %v672_v23 = vmul.f32 1.442695, %v595_v18  ;;  %v698_v30 = vmul.f32 1.442695, %v608_v36 }
 0x120   : > { %v1785_v3 = vpop.eup %1784  ;;  %1796 = vpow2.f32 %v676_v25  ;;  %v606_v43 = vsub.f32 %v4076_v41, %v3126_v47  ;;  %v700_v38 = vmul.f32 1.442695, %v609_v24  ;;  %v702_v12 = vmul.f32 1.442695, %v610_v56 }
 0x121   : > { %v1787_v28 = vpop.eup %1786  ;;  %1798 = vpow2.f32 %v678_v2  ;;  %v751_v60 = vsel %vm486_vm1, %v1775_v61, 0.0  ;;  %v607_v11 = vsub.f32 %v4077_v0, %v3126_v47  ;;  %v740_v46 = vadd.f32 %v1785_v3, %v1783_v57 }
 0x122   : > { %v1789_v27 = vpop.eup %1788  ;;  %1800 = vpow2.f32 %v668_v7  ;;  %v752_v4 = vadd.f32 %v751_v60, %v750_v5  ;;  %v692_v25 = vmul.f32 1.442695, %v605_v59  ;;  %v741_v18 = vsel %vm486_vm1, %v1787_v28, 0.0 }
 0x123   : > { %v1791_v26 = vpop.eup %1790  ;;  %1802 = vpow2.f32 %v670_v40  ;;  %v602_v36 = vsub.f32 %v2573_v51, %v3132_v50  ;;  %v742_v21 = vadd.f32 %v741_v18, %v740_v46  ;;  %v603_v61 = vsub.f32 %v2576_v53, %v3132_v50 }
 0x124   : > { %v1793_v2 = vpop.eup %1792  ;;  %1804 = vpow2.f32 %v672_v23  ;;  %753 = vadd.xlane.f32.xlu0 %v752_v4  ;;  %v3148_v7 = vpop.xlane.xlu2 %889  ;;  %v765_v24 = vadd.f32 %v1791_v26, %v1789_v27  ;;  %v694_v14 = vmul.f32 1.442695, %v606_v43  ;;  %v604_v56 = vsub.f32 %v2579_v54, %v3132_v50  ;;  %v4081_v54 = vld [vmem:[#allocation20_spill] sm:$0xff]  ;;  %v4082_v43 = vld [vmem:[#allocation21_spill] sm:$0xff]  ;;  %v4083_v27 = vld [vmem:[#allocation22_spill] sm:$0xff] }
 0x125   : > { %4078 = vst [vmem:[#allocation13_spill] sm:$0xff] %v3148_v7  ;;  %v1795_v5 = vpop.eup %1794  ;;  %1806 = vpow2.f32 %v698_v30  ;;  %v3152_v57 = vpop.xlane.xlu1 %899  ;;  %v766_v51 = vsel %vm486_vm1, %v1793_v2, 0.0  ;;  %v696_v6 = vmul.f32 1.442695, %v607_v11  ;;  %733 = vadd.xlane.f32.xlu2 %v732_v8  ;;  %743 = vadd.xlane.f32.xlu1 %v742_v21  ;;  %v686_v59 = vmul.f32 1.442695, %v602_v36 }
 0x126   : > { %4079 = vst [vmem:[#allocation14_spill] sm:$0xff] %v3152_v57  ;;  %v1797_v40 = vpop.eup %1796  ;;  %1808 = vpow2.f32 %v700_v38  ;;  %v745_v53 = vadd.f32 %v1779_v44, %v3118_v17  ;;  %v3156_v3 = vpop.xlane.xlu0 %564  ;;  %v746_v30 = vsel %vm486_vm1, %v1781_v39, 0.0  ;;  %v688_v38 = vmul.f32 1.442695, %v603_v61  ;;  %v3259_v50 = vld [vmem:[%s2356_s23 + $0x178] sm:$0xff] }
 0x127   : > { %4080 = vst [vmem:[#allocation15_spill] sm:$0xff] %v3156_v3  ;;  %v1799_v23 = vpop.eup %1798  ;;  %1810 = vpow2.f32 %v702_v12  ;;  %v611_v41 = vsub.f32 %v4081_v54, %v3156_v3  ;;  %v612_v28 = vsub.f32 %v4082_v43, %v3156_v3  ;;  %v767_v8 = vadd.f32 %v766_v51, %v765_v24 }
 0x128   : > { %v1801_v60 = vpop.eup %1800  ;;  %1812 = vpow2.f32 %v692_v25  ;;  %v613_v0 = vsub.f32 %v4083_v27, %v3156_v3  ;;  %v690_v44 = vmul.f32 1.442695, %v604_v56  ;;  %v747_v12 = vadd.f32 %v746_v30, %v745_v53  ;;  %v3181_v27 = vld [vmem:[%s2356_s23 + $0xe8] sm:$0xff]  ;;  %v3253_v3 = vld [vmem:[%s2356_s23 + $0x150] sm:$0xff] }
 0x129   : > { %v1803_v17 = vpop.eup %1802  ;;  %1814 = vpow2.f32 %v694_v14  ;;  %v704_v4 = vmul.f32 1.442695, %v611_v41  ;;  %v706_v18 = vmul.f32 1.442695, %v612_v28  ;;  %v761_v30 = vsel %vm486_vm1, %v1799_v23, 0.0  ;;  %v3175_v28 = vld [vmem:[%s2356_s23 + $0xd8] sm:$0xff] }
 0x12a   : > { %v1805_v11 = vpop.eup %1804  ;;  %1816 = vpow2.f32 %v696_v6  ;;  %v755_v39 = vadd.f32 %v1803_v17, %v1801_v60  ;;  %v708_v2 = vmul.f32 1.442695, %v613_v0  ;;  %v760_v6 = vadd.f32 %v1797_v40, %v1795_v5  ;;  %v3178_v60 = vld [vmem:[%s2356_s23 + $0xe0] sm:$0xff]  ;;  %4094 = vst [vmem:[#allocation64_spill] sm:$0xff] %v3253_v3 }
 0x12b   : > { %v1807_v46 = vpop.eup %1806  ;;  %1818 = vpow2.f32 %v686_v59  ;;  %v756_v26 = vsel %vm486_vm1, %v1805_v11, 0.0 }
 0x12c   : > { %v1809_v36 = vpop.eup %1808  ;;  %1820 = vpow2.f32 %v688_v38  ;;  %768 = vadd.xlane.f32.xlu0 %v767_v8  ;;  %v757_v25 = vadd.f32 %v756_v26, %v755_v39  ;;  %v3166_v21 = vpop.xlane.xlu2 %904  ;;  %v762_v8 = vadd.f32 %v761_v30, %v760_v6  ;;  %v3203_v30 = vld [vmem:[%s2356_s23 + $0x130] sm:$0xff] }
 0x12d   : > { %4084 = vst [vmem:[#allocation16_spill] sm:$0xff] %v3166_v21  ;;  %v1811_v61 = vpop.eup %1810  ;;  %1822 = vpow2.f32 %v690_v44  ;;  %v3168_v24 = vpop.xlane.xlu1 %914  ;;  %v780_v14 = vadd.f32 %v1809_v36, %v1807_v46  ;;  %748 = vadd.xlane.f32.xlu2 %v747_v12  ;;  %v1027_v44 = vmax.f32 %v3175_v28, %v3178_v60  ;;  %v1994_v21 = vld [vmem:[%s2350_s29 + $0x140] sm:$0xff] }
 0x12e   : > { %4085 = vst [vmem:[#allocation17_spill] sm:$0xff] %v3168_v24  ;;  %v1813_v56 = vpop.eup %1812  ;;  %758 = vadd.xlane.f32.xlu1 %v757_v25  ;;  %1824 = vpow2.f32 %v704_v4  ;;  %v781_v51 = vsel %vm486_vm1, %v1811_v61, 0.0  ;;  %v3171_v59 = vpop.xlane.xlu0 %894  ;;  %v1028_v4 = vsel %vm486_vm1, %v3181_v27, -inf }
 0x12f   : > { %4086 = vst [vmem:[#allocation20_spill] sm:$0xff] %v3171_v59  ;;  %v1815_v53 = vpop.eup %1814  ;;  %1826 = vpow2.f32 %v706_v18  ;;  %v782_v41 = vadd.f32 %v781_v51, %v780_v14  ;;  %v3197_v14 = vld [vmem:[%s2356_s23 + $0x120] sm:$0xff]  ;;  %v3200_v51 = vld [vmem:[%s2356_s23 + $0x128] sm:$0xff] }
 0x130   : > { %v1817_v54 = vpop.eup %1816  ;;  %1828 = vpow2.f32 %v708_v2  ;;  %v775_v26 = vadd.f32 %v1815_v53, %v1813_v56  ;;  %v1029_v2 = vmax.f32 %v1027_v44, %v1028_v4  ;;  %v3206_v53 = vld [vmem:[%s2356_s23 + $0x108] sm:$0xff]  ;;  %v1043_v44 = vsel %vm486_vm1, %v3203_v30, -inf }
 0x131   : > { %v1819_v43 = vpop.eup %1818  ;;  %v776_v36 = vsel %vm486_vm1, %v1817_v54, 0.0  ;;  %v3214_v54 = vld [vmem:[%s2356_s23 + $0x118] sm:$0xff] }
 0x132   : > { %v1821_v38 = vpop.eup %1820  ;;  %v777_v6 = vadd.f32 %v776_v36, %v775_v26  ;;  %v1038_v4 = vsel %vm486_vm1, %v3214_v54, -inf }
 0x133   : > { %v1823_v0 = vpop.eup %1822  ;;  %v770_v5 = vadd.f32 %v1821_v38, %v1819_v43  ;;  %v3217_v38 = vld [vmem:[%s2356_s23 + $0xf0] sm:$0xff] }
 0x134   : > { %v1825_v40 = vpop.eup %1824  ;;  %783 = vadd.xlane.f32.xlu0 %v782_v41  ;;  %v771_v17 = vsel %vm486_vm1, %v1823_v0, 0.0  ;;  %v3184_v23 = vpop.xlane.xlu2 %919  ;;  %v3209_v41 = vld [vmem:[%s2356_s23 + $0x110] sm:$0xff]  ;;  %v1042_v0 = vmax.f32 %v3197_v14, %v3200_v51 }
 0x135   : > { %4087 = vst [vmem:[#allocation21_spill] sm:$0xff] %v3184_v23  ;;  %v1827_v11 = vpop.eup %1826  ;;  %v772_v12 = vadd.f32 %v771_v17, %v770_v5  ;;  %v3188_v39 = vpop.xlane.xlu1 %929  ;;  %763 = vadd.xlane.f32.xlu2 %v762_v8  ;;  %v3220_v8 = vld [vmem:[%s2356_s23 + $0xf8] sm:$0xff]  ;;  %v398_v5 = vadd.s32 112, %v2491_v52  ;;  %v3228_v17 = vld [vmem:[%s2356_s23 + $0x100] sm:$0xff] }
 0x136   : > { %4088 = vst [vmem:[#allocation22_spill] sm:$0xff] %v3188_v39  ;;  %v1829_v46 = vpop.eup %1828  ;;  %v3192_v18 = vpop.xlane.xlu0 %909  ;;  %v785_v25 = vadd.f32 %v1827_v11, %v1825_v40  ;;  %v1037_v11 = vmax.f32 %v3206_v53, %v3209_v41  ;;  %v1033_v26 = vsel %vm486_vm1, %v3228_v17, -inf  ;;  %v1044_v36 = vmax.f32 %v1042_v0, %v1043_v44  ;;  %v3270_v44 = vld [vmem:[%s2356_s23 + $0x140] sm:$0xff] }
 0x137   : > { %4089 = vst [vmem:[#allocation59_spill] sm:$0xff] %v3192_v18  ;;  %773 = vadd.xlane.f32.xlu1 %v772_v12  ;;  %v786_v61 = vsel %vm486_vm1, %v1829_v46, 0.0  ;;  %v1032_v46 = vmax.f32 %v3217_v38, %v3220_v8  ;;  %v4106_v18 = vld [vmem:[#allocation36_spill] sm:$0xff] }
 0x138   : > { %v787_v56 = vadd.f32 %v786_v61, %v785_v25  ;;  %v3243_v25 = vadd.s32 %v2524_v9, %v398_v5  ;;  %v3247_v61 = vld [vmem:[%s2356_s23 + $0x168] sm:$0xff]  ;;  %v3267_v5 = vld [vmem:[%s2356_s23 + $0x138] sm:$0xff] }
 0x139   : > { %v1034_v55 = vmax.f32 %v1032_v46, %v1033_v26 }
 0x13a   : > { %4093 = vst [vmem:[#allocation63_spill] sm:$0xff] %v3243_v25  ;;  %vm3979_vm9 = vcmp.eq.s32.totalorder %v3243_v25, %v2511_v63  ;;  %vm464_vm10 = vcmp.eq.s32.totalorder %v3243_v25, %v2543_v29  ;;  %vm465_vm13 = vcmp.eq.s32.totalorder %v3243_v25, %v2557_v35 }
 0x13c   : > { %1030 = vmax.xlane.f32.xlu0 %v1029_v2  ;;  %v3211_v43 = vpop.xlane.xlu2 %934  ;;  %v397_v2 = vadd.s32 104, %v2491_v52 }
 0x13d   : > { %4090 = vst [vmem:[#allocation60_spill] sm:$0xff] %v3211_v43  ;;  %v3225_v40 = vpop.xlane.xlu1 %944  ;;  %778 = vadd.xlane.f32.xlu2 %v777_v6  ;;  %v3250_v6 = vld [vmem:[%s2356_s23 + $0x170] sm:$0xff]  ;;  %v3262_v43 = vld [vmem:[%s2356_s23 + $0x160] sm:$0xff] }
 0x13e   : > { %4091 = vst [vmem:[#allocation61_spill] sm:$0xff] %v3225_v40  ;;  %v3234_v12 = vpop.xlane.xlu0 %924  ;;  %v3256_v40 = vld [vmem:[%s2356_s23 + $0x158] sm:$0xff]  ;;  %v3286_v26 = vadd.s32 %v2524_v9, %v397_v2  ;;  %v1053_v23 = vsel %vm486_vm1, %v3262_v43, -inf  ;;  %v1047_v2 = vmax.f32 %v3267_v5, %v3270_v44 }
 0x13f   : > { %4092 = vst [vmem:[#allocation62_spill] sm:$0xff] %v3234_v12  ;;  %788 = vadd.xlane.f32.xlu1 %v787_v56  ;;  %v1039_v56 = vmax.f32 %v1037_v11, %v1038_v4  ;;  %v1057_v11 = vmax.f32 %v3247_v61, %v3250_v6  ;;  %v1052_v46 = vmax.f32 %v3253_v3, %v3256_v40 }
 0x140   : > { %4095 = vst [vmem:[#allocation65_spill] sm:$0xff] %v3256_v40  ;;  %vm460_vm12 = vcmp.eq.s32.totalorder %v3286_v26, %v2511_v63  ;;  %vm461_vm8 = vcmp.eq.s32.totalorder %v3286_v26, %v2543_v29 }
 0x141   : > { %4096 = vst [vmem:[#allocation66_spill] sm:$0xff] %v3262_v43 }
 0x142   : > { %4099 = vst [vmem:[#allocation69_spill] sm:$0xff] %v3286_v26 }
 0x144   : > { %v3264_v0 = vpop.xlane.xlu2 %949  ;;  %1045 = vmax.xlane.f32.xlu0 %v1044_v36  ;;  %v1058_v36 = vsel %vm486_vm1, %v3259_v50, -inf }
 0x145   : > { %4097 = vst [vmem:[#allocation67_spill] sm:$0xff] %v3264_v0  ;;  %v3279_v4 = vpop.xlane.xlu1 %990  ;;  %1040 = vmax.xlane.f32.xlu2 %v1039_v56  ;;  %v1048_v56 = vsel %vm486_vm1, %v3273_v37, -inf  ;;  %v1059_v19 = vmax.f32 %v1057_v11, %v1058_v36  ;;  %v1993_v36 = vld [vmem:[%s2350_s29 + $0x138] sm:$0xff] }
 0x146   : > { %4098 = vst [vmem:[#allocation68_spill] sm:$0xff] %v3279_v4  ;;  %v1065_v0 = vsub.f32 %v2880_v33, %v3279_v4  ;;  %v1066_v22 = vsub.f32 %v2883_v58, %v3279_v4  ;;  %v1067_v39 = vsub.f32 %v2890_v16, %v3279_v4  ;;  %v3298_v12 = vpop.xlane.xlu0 %939  ;;  %v1990_v33 = vld [vmem:[%s2350_s29 + $0x150] sm:$0xff]  ;;  %v877_v45 = vsel %vm460_vm12, %v1993_v36, 0.0 }
 0x147   : > { %4100 = vst [vmem:[#allocation70_spill] sm:$0xff] %v3298_v12  ;;  %1035 = vmax.xlane.f32.xlu1 %v1034_v55  ;;  %v880_v58 = vsel %vm3979_vm9, %v1990_v33, 0.0  ;;  %v1991_v12 = vld [vmem:[%s2350_s29 + $0x158] sm:$0xff]  ;;  %vm462_vm9 = vcmp.eq.s32.totalorder %v3286_v26, %v2557_v35 }
 0x148   : > { %v1116_v16 = vmul.f32 1.442695, %v1065_v0  ;;  %v1118_v1 = vmul.f32 1.442695, %v1066_v22  ;;  %v881_v55 = vsel %vm464_vm10, %v1991_v12, 0.0  ;;  %v1054_v22 = vmax.f32 %v1052_v46, %v1053_v23  ;;  %v1992_v0 = vld [vmem:[%s2350_s29 + $0x160] sm:$0xff] }
 0x149   : > { %v1120_v24 = vmul.f32 1.442695, %v1067_v39  ;;  %v882_v33 = vsel %vm465_vm13, %v1992_v0, 0.0  ;;  %v1049_v12 = vmax.f32 %v1047_v2, %v1048_v56  ;;  %v956_v11 = vadd.f32 %v881_v55, %v880_v58  ;;  %v1995_v46 = vld [vmem:[%s2350_s29 + $0x148] sm:$0xff]  ;;  %v4104_v58 = vld [vmem:[#allocation34_spill] sm:$0xff]  ;;  %v4115_v26 = vld [vmem:[#allocation43_spill] sm:$0xff] }
 0x14a   : > { %1830 = vpow2.f32 %v1116_v16  ;;  %v878_v23 = vsel %vm461_vm8, %v1994_v21, 0.0  ;;  %v879_v16 = vsel %vm462_vm9, %v1995_v46, 0.0  ;;  %v4103_v2 = vld [vmem:[#allocation33_spill] sm:$0xff]  ;;  %v957_v0 = vsel %vm486_vm1, %v882_v33, 0.0  ;;  %v4105_v21 = vld [vmem:[#allocation35_spill] sm:$0xff] }
 0x14b   : > { %1832 = vpow2.f32 %v1118_v1  ;;  %v4108_v46 = vld [vmem:[#allocation37_spill] sm:$0xff]  ;;  %v952_v33 = vsel %vm486_vm1, %v879_v16, 0.0 }
 0x14c   : > { %v3324_v39 = vpop.xlane.xlu2 %995  ;;  %1060 = vmax.xlane.f32.xlu0 %v1059_v19  ;;  %1834 = vpow2.f32 %v1120_v24  ;;  %v4107_v19 = vld [vmem:[#allocation38_spill] sm:$0xff] }
 0x14d   : > { %4101 = vst [vmem:[#allocation71_spill] sm:$0xff] %v3324_v39  ;;  %v3338_v1 = vpop.xlane.xlu1 %1005  ;;  %v1068_v56 = vsub.f32 %v4103_v2, %v3324_v39  ;;  %v1069_v55 = vsub.f32 %v4104_v58, %v3324_v39  ;;  %1055 = vmax.xlane.f32.xlu2 %v1054_v22  ;;  %v1070_v57 = vsub.f32 %v4108_v46, %v3324_v39  ;;  %v4110_v22 = vld [vmem:[#allocation39_spill] sm:$0xff]  ;;  %v4112_v46 = vld [vmem:[#allocation41_spill] sm:$0xff] }
 0x14e   : > { %4102 = vst [vmem:[#allocation72_spill] sm:$0xff] %v3338_v1  ;;  %v1074_v36 = vsub.f32 %v4105_v21, %v3338_v1  ;;  %v1075_v13 = vsub.f32 %v4106_v18, %v3338_v1  ;;  %v1076_v24 = vsub.f32 %v4107_v19, %v3338_v1  ;;  %v3353_v25 = vpop.xlane.xlu0 %985  ;;  %v951_v58 = vadd.f32 %v878_v23, %v877_v45  ;;  %v4111_v18 = vld [vmem:[#allocation40_spill] sm:$0xff] }
 0x14f   : > { %4109 = vst [vmem:[#allocation33_spill] sm:$0xff] %v3353_v25  ;;  %1050 = vmax.xlane.f32.xlu1 %v1049_v12  ;;  %v1122_v2 = vmul.f32 1.442695, %v1068_v56  ;;  %v1062_v34 = vsub.f32 %v4110_v22, %v3353_v25  ;;  %v1063_v9 = vsub.f32 %v4111_v18, %v3353_v25  ;;  %v1124_v1 = vmul.f32 1.442695, %v1069_v55 }
 0x150   : > { %v1134_v21 = vmul.f32 1.442695, %v1074_v36  ;;  %v1136_v4 = vmul.f32 1.442695, %v1075_v13  ;;  %v1138_v59 = vmul.f32 1.442695, %v1076_v24  ;;  %v1831_v19 = vpop.eup %1830  ;;  %v1064_v39 = vsub.f32 %v4112_v46, %v3353_v25 }
 0x151   : > { %1836 = vpow2.f32 %v1122_v2  ;;  %v1833_v12 = vpop.eup %1832  ;;  %v1126_v45 = vmul.f32 1.442695, %v1070_v57  ;;  %v958_v23 = vadd.f32 %v957_v0, %v956_v11  ;;  %v953_v56 = vadd.f32 %v952_v33, %v951_v58  ;;  %v4114_v2 = vld [vmem:[#allocation42_spill] sm:$0xff] }
 0x152   : > { %1838 = vpow2.f32 %v1134_v21  ;;  %v1835_v16 = vpop.eup %1834  ;;  %v1110_v7 = vmul.f32 1.442695, %v1062_v34  ;;  %v1112_v13 = vmul.f32 1.442695, %v1063_v9  ;;  %v1114_v36 = vmul.f32 1.442695, %v1064_v39 }
 0x153   : > { %1840 = vpow2.f32 %v1136_v4  ;;  %v4116_v21 = vld [vmem:[#allocation44_spill] sm:$0xff]  ;;  %v1211_v4 = vadd.f32 %v1833_v12, %v1831_v19  ;;  %v1212_v34 = vsel %vm486_vm1, %v1835_v16, 0.0 }
 0x154   : > { %1842 = vpow2.f32 %v1138_v59  ;;  %v3362_v24 = vpop.xlane.xlu2 %1010 }
 0x155   : > { %4113 = vst [vmem:[#allocation34_spill] sm:$0xff] %v3362_v24  ;;  %1844 = vpow2.f32 %v1124_v1  ;;  %v1077_v55 = vsub.f32 %v4114_v2, %v3362_v24  ;;  %v1078_v25 = vsub.f32 %v4115_v26, %v3362_v24  ;;  %v1079_v57 = vsub.f32 %v4116_v21, %v3362_v24  ;;  %959 = vadd.xlane.f32.xlu2 %v958_v23 }
 0x156   : > { %1846 = vpow2.f32 %v1126_v45  ;;  %v3371_v59 = vpop.xlane.xlu0 %1000  ;;  %v3395_v2 = vsel %vm423_vm7, %v4112_v46, 0.0 }
 0x157   : > { %4117 = vst [vmem:[#allocation35_spill] sm:$0xff] %v3371_v59  ;;  %v1837_v9 = vpop.eup %1836  ;;  %954 = vadd.xlane.f32.xlu1 %v953_v56  ;;  %1848 = vpow2.f32 %v1110_v7  ;;  %v1140_v11 = vmul.f32 1.442695, %v1077_v55  ;;  %v1142_v39 = vmul.f32 1.442695, %v1078_v25  ;;  %v1071_v26 = vsub.f32 %v2965_v10, %v3371_v59  ;;  %v4118_v56 = vld [vmem:[#allocation18_spill] sm:$0xff] }
 0x158   : > { %v1144_v1 = vmul.f32 1.442695, %v1079_v57  ;;  %v1839_v0 = vpop.eup %1838  ;;  %1850 = vpow2.f32 %v1112_v13  ;;  %v1072_v58 = vsub.f32 %v2968_v15, %v3371_v59  ;;  %v1073_v33 = vsub.f32 %v2976_v31, %v3371_v59 }
 0x159   : > { %v1841_v19 = vpop.eup %1840  ;;  %1852 = vpow2.f32 %v1114_v36  ;;  %v1128_v45 = vmul.f32 1.442695, %v1071_v26  ;;  %v1213_v25 = vadd.f32 %v1212_v34, %v1211_v4  ;;  %v3383_v10 = vsel %vm421_vm5, %v4110_v22, 0.0  ;;  %v3399_v4 = vpop.xlane.xlu1 %1020  ;;  %v4122_v26 = vld [vmem:[#allocation49_spill] sm:$0xff] }
 0x15a   : > { %v1843_v12 = vpop.eup %1842  ;;  %1854 = vpow2.f32 %v1140_v11  ;;  %v1130_v7 = vmul.f32 1.442695, %v1072_v58  ;;  %v1132_v16 = vmul.f32 1.442695, %v1073_v33  ;;  %v1335_v36 = vsel %vm422_vm6, %v4111_v18, 0.0  ;;  %4120 = vst [vmem:[#allocation38_spill] sm:$0xff] %v3399_v4 }
 0x15b   : > { %v1845_v23 = vpop.eup %1844  ;;  %1856 = vpow2.f32 %v1142_v39  ;;  %v1226_v21 = vadd.f32 %v1841_v19, %v1839_v0  ;;  %v1227_v57 = vsel %vm486_vm1, %v1843_v12, 0.0  ;;  %v4123_v12 = vld [vmem:[#allocation50_spill] sm:$0xff] }
 0x15c   : > { %v1847_v15 = vpop.eup %1846  ;;  %1858 = vpow2.f32 %v1144_v1  ;;  %v1216_v13 = vadd.f32 %v1845_v23, %v1837_v9  ;;  %v3385_v31 = vpop.xlane.xlu2 %1025 }
 0x15d   : > { %4119 = vst [vmem:[#allocation36_spill] sm:$0xff] %v3385_v31  ;;  %v1849_v55 = vpop.eup %1848  ;;  %1860 = vpow2.f32 %v1128_v45  ;;  %v1217_v22 = vsel %vm486_vm1, %v1847_v15, 0.0  ;;  %v1086_v18 = vsub.f32 %v2989_v20, %v3385_v31  ;;  %v1087_v46 = vsub.f32 %v2992_v49, %v3385_v31  ;;  %v4124_v45 = vld [vmem:[#allocation45_spill] sm:$0xff] }
 0x15e   : > { %v1851_v34 = vpop.eup %1850  ;;  %1862 = vpow2.f32 %v1130_v7  ;;  %v1218_v9 = vadd.f32 %v1217_v22, %v1216_v13  ;;  %v3401_v11 = vpop.xlane.xlu0 %1015  ;;  %v1083_v49 = vsub.f32 %v4124_v45, %v3399_v4  ;;  %v4125_v7 = vld [vmem:[#allocation48_spill] sm:$0xff]  ;;  %v4126_v13 = vld [vmem:[#allocation46_spill] sm:$0xff] }
 0x15f   : > { %4121 = vst [vmem:[#allocation37_spill] sm:$0xff] %v3401_v11  ;;  %v1853_v39 = vpop.eup %1852  ;;  %1214 = vadd.xlane.f32.xlu1 %v1213_v25  ;;  %1864 = vpow2.f32 %v1132_v16  ;;  %v1206_v1 = vadd.f32 %v1851_v34, %v1849_v55  ;;  %v1080_v0 = vsub.f32 %v2998_v42, %v3401_v11  ;;  %v1081_v58 = vsub.f32 %v4122_v26, %v3401_v11 }
 0x160   : > { %v1855_v33 = vpop.eup %1854  ;;  %1219 = vadd.xlane.f32.xlu2 %v1218_v9  ;;  %v1207_v19 = vsel %vm486_vm1, %v1853_v39, 0.0  ;;  %v1082_v20 = vsub.f32 %v4123_v12, %v3401_v11  ;;  %v1088_v23 = vsub.f32 %v4125_v7, %v3385_v31  ;;  %v1084_v55 = vsub.f32 %v4126_v13, %v3399_v4  ;;  %v4127_v39 = vld [vmem:[#allocation47_spill] sm:$0xff]  ;;  %v4128_v13 = vld [vmem:[#allocation24_spill] sm:$0xff] }
 0x161   : > { %v1857_v25 = vpop.eup %1856  ;;  %v1208_v16 = vadd.f32 %v1207_v19, %v1206_v1  ;;  %v1146_v15 = vmul.f32 1.442695, %v1080_v0  ;;  %v1148_v42 = vmul.f32 1.442695, %v1081_v58  ;;  %v1228_v34 = vadd.f32 %v1227_v57, %v1226_v21  ;;  %v1996_v19 = vld [vmem:[%s2356_s23 + $0x18] sm:$0xff]  ;;  %v1997_v57 = vld [vmem:[%s2356_s23 + $0x20] sm:$0xff] }
 0x162   : > { %v1859_v22 = vpop.eup %1858  ;;  %v1150_v9 = vmul.f32 1.442695, %v1082_v20  ;;  %v1085_v26 = vsub.f32 %v4127_v39, %v3399_v4  ;;  %v1158_v12 = vmul.f32 1.442695, %v1086_v18  ;;  %v1160_v7 = vmul.f32 1.442695, %v1087_v46 }
 0x163   : > { %v1861_v45 = vpop.eup %1860  ;;  %1209 = vadd.xlane.f32.xlu0 %v1208_v16  ;;  %1866 = vpow2.f32 %v1146_v15  ;;  %v1231_v31 = vadd.f32 %v1857_v25, %v1855_v33  ;;  %v1232_v1 = vsel %vm486_vm1, %v1859_v22, 0.0  ;;  %v1162_v58 = vmul.f32 1.442695, %v1088_v23  ;;  %v1998_v23 = vld [vmem:[%s2356_s23 + $0x28] sm:$0xff] }
 0x164   : > { %v1863_v0 = vpop.eup %1862  ;;  %1868 = vpow2.f32 %v1148_v42  ;;  %v1337_v21 = vsel %vm424_vm14, %v1996_v19, 0.0  ;;  %v1338_v18 = vsel %vm425_vm15, %v1997_v57, 0.0  ;;  %v1152_v46 = vmul.f32 1.442695, %v1083_v49 }
 0x165   : > { %v1865_v20 = vpop.eup %1864  ;;  %1870 = vpow2.f32 %v1150_v9  ;;  %v1233_v33 = vadd.f32 %v1232_v1, %v1231_v31  ;;  %v1221_v25 = vadd.f32 %v1863_v0, %v1861_v45  ;;  %v1154_v16 = vmul.f32 1.442695, %v1084_v55  ;;  %v4129_v1 = vld [vmem:[#allocation11_spill] sm:$0xff] }
 0x166   : > { %1872 = vpow2.f32 %v1158_v12  ;;  %v1222_v15 = vsel %vm486_vm1, %v1865_v20, 0.0  ;;  %v1339_v42 = vsel %vm426_vm0, %v1998_v23, 0.0  ;;  %v1156_v22 = vmul.f32 1.442695, %v1085_v26  ;;  %v2000_v0 = vld [vmem:[%s2356_s23 + $0x38] sm:$0xff] }
 0x167   : > { %1229 = vadd.xlane.f32.xlu1 %v1228_v34  ;;  %1874 = vpow2.f32 %v1160_v7  ;;  %v1382_v39 = vadd.f32 %v1335_v36, %v3383_v10  ;;  %v1223_v19 = vadd.f32 %v1222_v15, %v1221_v25  ;;  %v1383_v31 = vsel %vm486_vm1, %v3395_v2, 0.0  ;;  %v1999_v7 = vld [vmem:[%s2356_s23 + $0x30] sm:$0xff] }
 0x168   : > { %1876 = vpow2.f32 %v1162_v58  ;;  %1234 = vadd.xlane.f32.xlu2 %v1233_v33  ;;  %v1387_v49 = vadd.f32 %v1338_v18, %v1337_v21  ;;  %v1388_v9 = vsel %vm486_vm1, %v1339_v42, 0.0  ;;  %vm4130_vm5 = vcmp.eq.s32.totalorder %v4129_v1, %v2511_v63  ;;  %v2001_v18 = vld [vmem:[%s2356_s23 + $0x40] sm:$0xff] }
 0x169   : > { %v1867_v55 = vpop.eup %1866  ;;  %1878 = vpow2.f32 %v1152_v46  ;;  %v1384_v26 = vadd.f32 %v1383_v31, %v1382_v39  ;;  %v1340_v2 = vsel %vm4130_vm5, %v1999_v7, 0.0  ;;  %vm4131_vm6 = vcmp.eq.s32.totalorder %v4129_v1, %v2543_v29 }
 0x16a   : > { %v1869_v12 = vpop.eup %1868  ;;  %1880 = vpow2.f32 %v1154_v16  ;;  %v1389_v45 = vadd.f32 %v1388_v9, %v1387_v49  ;;  %v1341_v58 = vsel %vm4131_vm6, %v2000_v0, 0.0  ;;  %vm4132_vm7 = vcmp.eq.s32.totalorder %v4129_v1, %v2557_v35  ;;  %v2002_v9 = vld [vmem:[%s2356_s23 + $0x60] sm:$0xff]  ;;  %v2005_v0 = vld [vmem:[%s2356_s23 + $0x48] sm:$0xff] }
 0x16b   : > { %v1871_v34 = vpop.eup %1870  ;;  %1882 = vpow2.f32 %v1156_v22  ;;  %1224 = vadd.xlane.f32.xlu0 %v1223_v19  ;;  %v1236_v10 = vadd.f32 %v1869_v12, %v1867_v55  ;;  %v1342_v20 = vsel %vm4132_vm7, %v2001_v18, 0.0  ;;  %v1392_v25 = vadd.f32 %v1341_v58, %v1340_v2  ;;  %v4133_v12 = vld [vmem:[#allocation27_spill] sm:$0xff]  ;;  %v2016_v1 = vld [vmem:[%s2356_s23 + $0xa0] sm:$0xff] }
 0x16c   : > { %v1873_v36 = vpop.eup %1872  ;;  %v1237_v21 = vsel %vm486_vm1, %v1871_v34, 0.0  ;;  %v1393_v23 = vsel %vm486_vm1, %v1342_v20, 0.0  ;;  %vm4134_vm14 = vcmp.eq.s32.totalorder %v4133_v12, %v2511_v63  ;;  %vm4135_vm15 = vcmp.eq.s32.totalorder %v4133_v12, %v2543_v29  ;;  %v4137_v58 = vld [vmem:[#allocation19_spill] sm:$0xff] }
 0x16d   : > { %v1875_v57 = vpop.eup %1874  ;;  %v1238_v16 = vadd.f32 %v1237_v21, %v1236_v10  ;;  %v1394_v19 = vadd.f32 %v1393_v23, %v1392_v25  ;;  %v1346_v34 = vsel %vm4134_vm14, %v2002_v9, 0.0  ;;  %vm4136_vm0 = vcmp.eq.s32.totalorder %v4133_v12, %v2557_v35  ;;  %v2012_v12 = vld [vmem:[%s2356_s23 + $0xb0] sm:$0xff] }
 0x16e   : > { %v1877_v46 = vpop.eup %1876  ;;  %v1246_v42 = vadd.f32 %v1875_v57, %v1873_v36  ;;  %v2004_v36 = vld [vmem:[%s2356_s23 + $0x70] sm:$0xff]  ;;  %vm4138_vm5 = vcmp.eq.s32.totalorder %v4137_v58, %v2511_v63  ;;  %vm4139_vm6 = vcmp.eq.s32.totalorder %v4137_v58, %v2543_v29  ;;  %vm4140_vm7 = vcmp.eq.s32.totalorder %v4137_v58, %v2557_v35 }
 0x16f   : > { %v1879_v33 = vpop.eup %1878  ;;  %1385 = vadd.xlane.f32.xlu1 %v1384_v26  ;;  %v1247_v39 = vsel %vm486_vm1, %v1877_v46, 0.0  ;;  %v2003_v26 = vld [vmem:[%s2356_s23 + $0x68] sm:$0xff]  ;;  %v1343_v21 = vsel %vm4138_vm5, %v2005_v0, 0.0  ;;  %v2006_v57 = vld [vmem:[%s2356_s23 + $0x50] sm:$0xff]  ;;  %v2007_v46 = vld [vmem:[%s2356_s23 + $0x58] sm:$0xff]  ;;  %v1356_v58 = vsel %vm443_vm3, %v2012_v12, 0.0 }
 0x170   : > { %v1881_v15 = vpop.eup %1880  ;;  %1390 = vadd.xlane.f32.xlu2 %v1389_v45  ;;  %v1248_v49 = vadd.f32 %v1247_v39, %v1246_v42  ;;  %v1347_v10 = vsel %vm4135_vm15, %v2003_v26, 0.0  ;;  %v1348_v45 = vsel %vm4136_vm0, %v2004_v36, 0.0  ;;  %v1344_v18 = vsel %vm4139_vm6, %v2006_v57, 0.0 }
 0x171   : > { %v1883_v22 = vpop.eup %1882  ;;  %v1241_v31 = vadd.f32 %v1881_v15, %v1879_v33  ;;  %v1402_v2 = vadd.f32 %v1347_v10, %v1346_v34  ;;  %v1403_v20 = vsel %vm486_vm1, %v1348_v45, 0.0  ;;  %v1345_v33 = vsel %vm4140_vm7, %v2007_v46, 0.0 }
 0x172   : > { %v1242_v55 = vsel %vm486_vm1, %v1883_v22, 0.0  ;;  %v1397_v25 = vadd.f32 %v1344_v18, %v1343_v21  ;;  %v1398_v15 = vsel %vm486_vm1, %v1345_v33, 0.0 }
 0x173   : > { %1239 = vadd.xlane.f32.xlu0 %v1238_v16  ;;  %v1243_v7 = vadd.f32 %v1242_v55, %v1241_v31  ;;  %v1404_v16 = vadd.f32 %v1403_v20, %v1402_v2 }
 0x174   : > { %v1399_v23 = vadd.f32 %v1398_v15, %v1397_v25  ;;  %v4151_v15 = vld [vmem:[#allocation23_spill] sm:$0xff] }
 0x175   : > { %vm4152_vm14 = vcmp.eq.s32.totalorder %v4151_v15, %v2511_v63  ;;  %vm4153_vm15 = vcmp.eq.s32.totalorder %v4151_v15, %v2543_v29  ;;  %vm4154_vm0 = vcmp.eq.s32.totalorder %v4151_v15, %v2557_v35 }
 0x177   : > { %1395 = vadd.xlane.f32.xlu1 %v1394_v19 }
 0x178   : > { %1249 = vadd.xlane.f32.xlu2 %v1248_v49 }
 0x17b   : > { %1244 = vadd.xlane.f32.xlu0 %v1243_v7 }
 0x180   : > { %1405 = vadd.xlane.f32.xlu2 %v1404_v16  ;;  %v2008_v16 = vld [vmem:[%s2356_s23 + $0x78] sm:$0xff] }
 0x183   : > { %1400 = vadd.xlane.f32.xlu0 %v1399_v23  ;;  %v1349_v23 = vsel %vm4152_vm14, %v2008_v16, 0.0 }
 0x186   : > { %v724_v42 = vpop.xlane.xlu0 %723 }
 0x187   : > { %v714_v22 = vpop.xlane.xlu1 %713  ;;  %1884 = vlog2.f32 %v724_v42 }
 0x18e   : > { %v3482_v39 = vpop.xlane.xlu0 %738 }
 0x18f   : > { %4141 = vst [vmem:[#allocation39_spill] sm:$0xff] %v3482_v39 }
 0x190   : > { %v3484_v19 = vpop.xlane.xlu1 %728  ;;  %v3486_v31 = vpop.xlane.xlu2 %718 }
 0x197   : > { %v3488_v49 = vpop.xlane.xlu0 %753 }
 0x198   : > { %4142 = vst [vmem:[#allocation40_spill] sm:$0xff] %v3488_v49  ;;  %v3490_v55 = vpop.xlane.xlu2 %733  ;;  %v3492_v9 = vpop.xlane.xlu1 %743 }
 0x199   : > { %4143 = vst [vmem:[#allocation41_spill] sm:$0xff] %v3492_v9 }
 0x19f   : > { %v3494_v34 = vpop.xlane.xlu0 %768 }
 0x1a0   : > { %4144 = vst [vmem:[#allocation42_spill] sm:$0xff] %v3494_v34  ;;  %v3496_v26 = vpop.xlane.xlu2 %748  ;;  %v2010_v34 = vld [vmem:[%s2356_s23 + $0x88] sm:$0xff] }
 0x1a1   : > { %4145 = vst [vmem:[#allocation43_spill] sm:$0xff] %v3496_v26  ;;  %v3498_v10 = vpop.xlane.xlu1 %758  ;;  %v1351_v42 = vsel %vm4154_vm0, %v2010_v34, 0.0 }
 0x1a2   : > { %4146 = vst [vmem:[#allocation44_spill] sm:$0xff] %v3498_v10 }
 0x1a7   : > { %v784_v36 = vpop.xlane.xlu0 %783 }
 0x1a8   : > { %v3500_v45 = vpop.xlane.xlu2 %763 }
 0x1a9   : > { %4147 = vst [vmem:[#allocation18_spill] sm:$0xff] %v3500_v45 }
 0x1aa   : > { %v3502_v7 = vpop.xlane.xlu1 %773 }
 0x1ab   : > { %4148 = vst [vmem:[#allocation49_spill] sm:$0xff] %v3502_v7  ;;  %v2009_v7 = vld [vmem:[%s2356_s23 + $0x80] sm:$0xff] }
 0x1af   : > { %v3504_v2 = vpop.xlane.xlu0 %1030 }
 0x1b0   : > { %4149 = vst [vmem:[#allocation50_spill] sm:$0xff] %v3504_v2  ;;  %v1089_v0 = vsub.f32 %v3175_v28, %v3504_v2  ;;  %v1090_v21 = vsub.f32 %v3178_v60, %v3504_v2  ;;  %v1091_v57 = vsub.f32 %v3181_v27, %v3504_v2  ;;  %v779_v18 = vpop.xlane.xlu2 %778  ;;  %v1350_v2 = vsel %vm4153_vm15, %v2009_v7, 0.0 }
 0x1b1   : > { %v1408_v7 = vsel %vm486_vm1, %v1351_v42, 0.0 }
 0x1b2   : > { %v3512_v20 = vpop.xlane.xlu1 %788  ;;  %v1164_v46 = vmul.f32 1.442695, %v1089_v0  ;;  %v1166_v33 = vmul.f32 1.442695, %v1090_v21  ;;  %v1168_v25 = vmul.f32 1.442695, %v1091_v57  ;;  %v3530_v57 = vpop.eup %1884 }
 0x1b3   : > { %4150 = vst [vmem:[#allocation45_spill] sm:$0xff] %v3512_v20 }
 0x1b4   : > { %1886 = vpow2.f32 %v1164_v46 }
 0x1b5   : > { %1888 = vpow2.f32 %v1166_v33  ;;  %v1407_v33 = vadd.f32 %v1350_v2, %v1349_v23 }
 0x1b6   : > { %1890 = vpow2.f32 %v1168_v25  ;;  %v2011_v25 = vld [vmem:[%s2356_s23 + $0xa8] sm:$0xff] }
 0x1b7   : > { %1892 = vlog2.f32 %v714_v22  ;;  %v3526_v0 = vpop.xlane.xlu0 %1045  ;;  %v1355_v34 = vsel %vm442_vm4, %v2011_v25, 0.0 }
 0x1b8   : > { %4155 = vst [vmem:[#allocation48_spill] sm:$0xff] %v3526_v0  ;;  %1894 = vlog2.f32 %v784_v36  ;;  %v1098_v21 = vsub.f32 %v3197_v14, %v3526_v0  ;;  %v3532_v46 = vpop.xlane.xlu2 %1040  ;;  %v1099_v2 = vsub.f32 %v3200_v51, %v3526_v0  ;;  %v1100_v39 = vsub.f32 %v3203_v30, %v3526_v0 }
 0x1b9   : > { %1896 = vlog2.f32 %v779_v18  ;;  %4156 = vst [vmem:[#allocation46_spill] sm:$0xff] %v3532_v46  ;;  %v1095_v36 = vsub.f32 %v3206_v53, %v3532_v46  ;;  %v1096_v20 = vsub.f32 %v3209_v41, %v3532_v46  ;;  %v1097_v18 = vsub.f32 %v3214_v54, %v3532_v46 }
 0x1ba   : > { %v1887_v22 = vpop.eup %1886  ;;  %v3545_v11 = vpop.xlane.xlu1 %1035  ;;  %v1182_v10 = vmul.f32 1.442695, %v1098_v21  ;;  %v1409_v0 = vadd.f32 %v1408_v7, %v1407_v33  ;;  %v3568_v59 = vadd.f32 %v1356_v58, %v1355_v34  ;;  %v4161_v33 = vld [vmem:[#allocation26_spill] sm:$0xff] }
 0x1bb   : > { %4158 = vst [vmem:[#allocation47_spill] sm:$0xff] %v3545_v11  ;;  %v1889_v23 = vpop.eup %1888  ;;  %v1092_v42 = vsub.f32 %v3217_v38, %v3545_v11  ;;  %v1093_v25 = vsub.f32 %v3220_v8, %v3545_v11  ;;  %v1094_v45 = vsub.f32 %v3228_v17, %v3545_v11  ;;  %v1176_v46 = vmul.f32 1.442695, %v1095_v36 }
 0x1bc   : > { %v1891_v4 = vpop.eup %1890  ;;  %v1178_v15 = vmul.f32 1.442695, %v1096_v20  ;;  %v1180_v49 = vmul.f32 1.442695, %v1097_v18  ;;  %v1251_v24 = vadd.f32 %v1889_v23, %v1887_v22  ;;  %1898 = vpow2.f32 %v1182_v10  ;;  %v2013_v20 = vld [vmem:[%s2356_s23 + $0xb8] sm:$0xff] }
 0x1bd   : > { %v3555_v26 = vpop.eup %1892  ;;  %v1170_v9 = vmul.f32 1.442695, %v1092_v42  ;;  %1900 = vpow2.f32 %v1176_v46  ;;  %v1172_v21 = vmul.f32 1.442695, %v1093_v25  ;;  %v1252_v36 = vsel %vm486_vm1, %v1891_v4, 0.0 }
 0x1be   : > { %v1895_v11 = vpop.eup %1894  ;;  %v1357_v22 = vsel %vm444_vm2, %v2013_v20, 0.0  ;;  %1902 = vpow2.f32 %v1178_v15  ;;  %v1174_v23 = vmul.f32 1.442695, %v1094_v45  ;;  %v1253_v42 = vadd.f32 %v1252_v36, %v1251_v24  ;;  %v2014_v15 = vld [vmem:[%s2356_s23 + $0x90] sm:$0xff]  ;;  %v2015_v20 = vld [vmem:[%s2356_s23 + $0x98] sm:$0xff] }
 0x1bf   : > { %v1897_v18 = vpop.eup %1896  ;;  %1904 = vpow2.f32 %v1180_v49  ;;  %v1184_v10 = vmul.f32 1.442695, %v1099_v2  ;;  %v819_v12 = vmul.f32 0.6931472, %v1895_v11  ;;  %v1186_v4 = vmul.f32 1.442695, %v1100_v39  ;;  %v3589_v34 = vpop.xlane.xlu0 %1060 }
 0x1c0   : > { %1906 = vpow2.f32 %v1170_v9  ;;  %v3570_v46 = vpop.xlane.xlu2 %1055  ;;  %1254 = vadd.xlane.f32.xlu1 %v1253_v42  ;;  %v3573_v25 = vsel %vm486_vm1, %v1357_v22, 0.0  ;;  %v817_v45 = vmul.f32 0.6931472, %v1897_v18  ;;  %vm4162_vm2 = vcmp.eq.s32.totalorder %v4161_v33, %v2511_v63 }
 0x1c1   : > { %4159 = vst [vmem:[#allocation24_spill] sm:$0xff] %v3570_v46  ;;  %1908 = vpow2.f32 %v1172_v21  ;;  %v1104_v24 = vsub.f32 %v3253_v3, %v3570_v46  ;;  %v1105_v49 = vsub.f32 %v3256_v40, %v3570_v46  ;;  %v1106_v58 = vsub.f32 %v3262_v43, %v3570_v46 }
 0x1c2   : > { %v3581_v11 = vpop.xlane.xlu1 %1050  ;;  %v1899_v9 = vpop.eup %1898  ;;  %1910 = vpow2.f32 %v1174_v23  ;;  %v1352_v7 = vsel %vm4162_vm2, %v2014_v15, 0.0  ;;  %vm4163_vm3 = vcmp.eq.s32.totalorder %v4161_v33, %v2543_v29  ;;  %v3600_v15 = vadd.f32 %v819_v12, %v3122_v32 }
 0x1c3   : > { %4160 = vst [vmem:[#allocation73_spill] sm:$0xff] %v3581_v11  ;;  %v1101_v39 = vsub.f32 %v3267_v5, %v3581_v11  ;;  %v1901_v2 = vpop.eup %1900  ;;  %v1194_v21 = vmul.f32 1.442695, %v1104_v24  ;;  %v1102_v36 = vsub.f32 %v3270_v44, %v3581_v11  ;;  %1912 = vpow2.f32 %v1184_v10 }
 0x1c4   : > { %v1353_v22 = vsel %vm4163_vm3, %v2015_v20, 0.0  ;;  %v1903_v18 = vpop.eup %1902  ;;  %v1196_v23 = vmul.f32 1.442695, %v1105_v49  ;;  %v1103_v42 = vsub.f32 %v3273_v37, %v3581_v11  ;;  %1914 = vpow2.f32 %v1186_v4 }
 0x1c5   : > { %v1905_v46 = vpop.eup %1904  ;;  %v1198_v24 = vmul.f32 1.442695, %v1106_v58  ;;  %v1261_v16 = vadd.f32 %v1903_v18, %v1901_v2  ;;  %vm4164_vm4 = vcmp.eq.s32.totalorder %v4161_v33, %v2557_v35  ;;  %v1107_v20 = vsub.f32 %v3247_v61, %v3589_v34 }
 0x1c6   : > { %v1354_v10 = vsel %vm4164_vm4, %v2016_v1, 0.0  ;;  %v1907_v43 = vpop.eup %1906  ;;  %v1188_v49 = vmul.f32 1.442695, %v1101_v39  ;;  %v1262_v40 = vsel %vm486_vm1, %v1905_v46, 0.0  ;;  %v3610_v4 = vadd.f32 %v817_v45, %v3126_v47 }
 0x1c7   : > { %v1412_v32 = vadd.f32 %v1353_v22, %v1352_v7  ;;  %v1909_v12 = vpop.eup %1908  ;;  %1916 = vpow2.f32 %v1194_v21  ;;  %v1190_v58 = vmul.f32 1.442695, %v1102_v36  ;;  %v1263_v2 = vadd.f32 %v1262_v40, %v1261_v16 }
 0x1c8   : > { %v1108_v18 = vsub.f32 %v3250_v6, %v3589_v34  ;;  %v1911_v11 = vpop.eup %1910  ;;  %1918 = vpow2.f32 %v1196_v23  ;;  %v1192_v1 = vmul.f32 1.442695, %v1103_v42  ;;  %v3614_v33 = vpop.xlane.xlu2 %959  ;;  %v1256_v3 = vadd.f32 %v1909_v12, %v1907_v43  ;;  %1410 = vadd.xlane.f32.xlu1 %v1409_v0  ;;  %v2017_v23 = vld [vmem:[%s2356_s23 + $0xc0] sm:$0xff]  ;;  %v4165_v42 = vld [vmem:[#allocation25_spill] sm:$0xff] }
 0x1c9   : > { %v1109_v46 = vsub.f32 %v3259_v50, %v3589_v34  ;;  %v1913_v47 = vpop.eup %1912  ;;  %1920 = vpow2.f32 %v1198_v24  ;;  %1264 = vadd.xlane.f32.xlu2 %v1263_v2  ;;  %v980_v40 = vsub.f32 %v3600_v15, %v3614_v33  ;;  %v1257_v45 = vsel %vm486_vm1, %v1911_v11, 0.0  ;;  %v2019_v2 = vld [vmem:[%s2356_s23 + $0xd0] sm:$0xff] }
 0x1ca   : > { %v3620_v16 = vpop.xlane.xlu1 %954  ;;  %v1200_v39 = vmul.f32 1.442695, %v1107_v20  ;;  %v1915_v7 = vpop.eup %1914  ;;  %1922 = vpow2.f32 %v1188_v49  ;;  %v1258_v0 = vadd.f32 %v1257_v45, %v1256_v3  ;;  %v1266_v21 = vadd.f32 %v1913_v47, %v1899_v9  ;;  %v2018_v49 = vld [vmem:[%s2356_s23 + $0xc8] sm:$0xff] }
 0x1cb   : > { %v979_v43 = vsub.f32 %v3610_v4, %v3620_v16  ;;  %1924 = vpow2.f32 %v1190_v58  ;;  %v1267_v36 = vsel %vm486_vm1, %v1915_v7, 0.0  ;;  %v1202_v22 = vmul.f32 1.442695, %v1108_v18 }
 0x1cc   : > { %vm4166_vm5 = vcmp.eq.s32.totalorder %v4165_v42, %v2511_v63  ;;  %1926 = vpow2.f32 %v1192_v1  ;;  %1259 = vadd.xlane.f32.xlu0 %v1258_v0  ;;  %v1268_v11 = vadd.f32 %v1267_v36, %v1266_v21  ;;  %v1204_v20 = vmul.f32 1.442695, %v1109_v46 }
 0x1cd   : > { %v1358_v24 = vsel %vm4166_vm5, %v2017_v23, 0.0  ;;  %vm4167_vm6 = vcmp.eq.s32.totalorder %v4165_v42, %v2543_v29  ;;  %v1917_v9 = vpop.eup %1916  ;;  %1928 = vlog2.f32 %v3486_v31  ;;  %v1419_v12 = vadd.f32 %v3573_v25, %v3568_v59 }
 0x1ce   : > { %v1359_v3 = vsel %vm4167_vm6, %v2018_v49, 0.0  ;;  %v1413_v58 = vsel %vm486_vm1, %v1354_v10, 0.0  ;;  %vm4168_vm7 = vcmp.eq.s32.totalorder %v4165_v42, %v2557_v35  ;;  %v1919_v1 = vpop.eup %1918  ;;  %1930 = vpow2.f32 %v1200_v39  ;;  %v4169_v39 = vld [vmem:[#allocation32_spill] sm:$0xff] }
 0x1cf   : > { %v1360_v18 = vsel %vm4168_vm7, %v2019_v2, 0.0  ;;  %v1921_v46 = vpop.eup %1920  ;;  %1932 = vpow2.f32 %v1202_v22  ;;  %v1422_v47 = vadd.f32 %v1359_v3, %v1358_v24  ;;  %v1414_v7 = vadd.f32 %v1413_v58, %v1412_v32 }
 0x1d0   : > { %v1923_v45 = vpop.eup %1922  ;;  %1269 = vadd.xlane.f32.xlu1 %v1268_v11  ;;  %1934 = vpow2.f32 %v1204_v20  ;;  %v1423_v31 = vsel %vm486_vm1, %v1360_v18, 0.0  ;;  %v1276_v25 = vadd.f32 %v1919_v1, %v1917_v9  ;;  %v1277_v21 = vsel %vm486_vm1, %v1921_v46, 0.0 }
 0x1d1   : > { %v1925_v0 = vpop.eup %1924  ;;  %1420 = vadd.xlane.f32.xlu2 %v1419_v12  ;;  %v1424_v49 = vadd.f32 %v1423_v31, %v1422_v47  ;;  %v1364_v22 = vsel %vm451_vm11, %v3217_v38, 0.0  ;;  %vm4170_vm14 = vcmp.eq.s32.totalorder %v4169_v39, %v2543_v29  ;;  %vm4171_vm15 = vcmp.eq.s32.totalorder %v4169_v39, %v2557_v35 }
 0x1d2   : > { %v1215_v59 = vpop.xlane.xlu1 %1214  ;;  %v1927_v10 = vpop.eup %1926  ;;  %v1271_v24 = vadd.f32 %v1925_v0, %v1923_v45  ;;  %v1365_v11 = vsel %vm4170_vm14, %v3220_v8, 0.0  ;;  %v1366_v20 = vsel %vm4171_vm15, %v3228_v17, 0.0  ;;  %v1278_v9 = vadd.f32 %v1277_v21, %v1276_v25  ;;  %v4172_v8 = vld [vmem:[#allocation28_spill] sm:$0xff] }
 0x1d3   : > { %v1220_v36 = vpop.xlane.xlu2 %1219  ;;  %v1929_v23 = vpop.eup %1928  ;;  %1936 = vlog2.f32 %v1215_v59  ;;  %v1272_v12 = vsel %vm486_vm1, %v1927_v10, 0.0  ;;  %v791_v2 = vmul.f32 0.6931472, %v3555_v26  ;;  %v1432_v1 = vadd.f32 %v1365_v11, %v1364_v22  ;;  %v4177_v11 = vld [vmem:[#allocation31_spill] sm:$0xff] }
 0x1d4   : > { %v1931_v32 = vpop.eup %1930  ;;  %1415 = vadd.xlane.f32.xlu0 %v1414_v7  ;;  %v793_v18 = vmul.f32 0.6931472, %v1929_v23  ;;  %v1433_v46 = vsel %vm486_vm1, %v1366_v20, 0.0  ;;  %vm4173_vm11 = vcmp.eq.s32.totalorder %v4172_v8, %v2511_v63  ;;  %v1273_v45 = vadd.f32 %v1272_v12, %v1271_v24 }
 0x1d5   : > { %v1933_v3 = vpop.eup %1932  ;;  %v1361_v47 = vsel %vm4173_vm11, %v3175_v28, 0.0  ;;  %vm4174_vm0 = vcmp.eq.s32.totalorder %v4172_v8, %v2543_v29  ;;  %vm4175_vm2 = vcmp.eq.s32.totalorder %v4172_v8, %v2557_v35  ;;  %v3672_v31 = vmul.f32 0.6931472, %v3530_v57 }
 0x1d6   : > { %v1210_v58 = vpop.xlane.xlu0 %1209  ;;  %v1935_v38 = vpop.eup %1934  ;;  %v1362_v17 = vsel %vm4174_vm0, %v3178_v60, 0.0  ;;  %v1363_v26 = vsel %vm4175_vm2, %v3181_v27, 0.0  ;;  %v1281_v7 = vadd.f32 %v1933_v3, %v1931_v32  ;;  %v822_v25 = vadd.f32 %v791_v2, %v3030_v62  ;;  %v4176_v32 = vld [vmem:[#allocation69_spill] sm:$0xff] }
 0x1d7   : > { %1938 = vlog2.f32 %v1210_v58  ;;  %v1282_v28 = vsel %vm486_vm1, %v1935_v38, 0.0  ;;  %v823_v60 = vadd.f32 %v793_v18, %v3052_v48  ;;  %v399_v21 = vadd.s32 120, %v2491_v52  ;;  %v4183_v58 = vld [vmem:[#allocation33_spill] sm:$0xff]  ;;  %v4184_v18 = vld [vmem:[#allocation20_spill] sm:$0xff] }
 0x1d8   : > { %1425 = vadd.xlane.f32.xlu1 %v1424_v49  ;;  %1940 = vlog2.f32 %v3484_v19  ;;  %v1434_v27 = vadd.f32 %v1433_v46, %v1432_v1  ;;  %v1427_v23 = vadd.f32 %v1362_v17, %v1361_v47  ;;  %v1428_v57 = vsel %vm486_vm1, %v1363_v26, 0.0 }
 0x1d9   : > { %1279 = vadd.xlane.f32.xlu2 %v1278_v9  ;;  %v1937_v59 = vpop.eup %1936  ;;  %1942 = vlog2.f32 %v1220_v36  ;;  %v1283_v22 = vadd.f32 %v1282_v28, %v1281_v7  ;;  %v1373_v62 = vsel %vm460_vm12, %v3267_v5, 0.0  ;;  %v1374_v48 = vsel %vm461_vm8, %v3270_v44, 0.0  ;;  %v4180_v44 = vld [vmem:[#allocation13_spill] sm:$0xff]  ;;  %v4182_v9 = vld [vmem:[#allocation10_spill] sm:$0xff]  ;;  %v4188_v7 = vld [vmem:[#allocation68_spill] sm:$0xff] }
 0x1da   : > { %v1230_v0 = vpop.xlane.xlu1 %1229  ;;  %v1375_v52 = vsel %vm462_vm9, %v3273_v37, 0.0  ;;  %v1289_v19 = vmul.f32 0.6931472, %v1937_v59  ;;  %vm4178_vm3 = vcmp.eq.s32.totalorder %v4177_v11, %v2511_v63  ;;  %vm4179_vm12 = vcmp.eq.s32.totalorder %v4177_v11, %v2543_v29 }
 0x1db   : > { %v3678_v10 = vpop.xlane.xlu2 %1234  ;;  %v1370_v20 = vsel %vm4178_vm3, %v3197_v14, 0.0  ;;  %v1371_v5 = vsel %vm4179_vm12, %v3200_v51, 0.0  ;;  %1944 = vlog2.f32 %v3490_v55  ;;  %v966_v3 = vsub.f32 %v822_v25, %v4180_v44  ;;  %v4185_v55 = vld [vmem:[#allocation29_spill] sm:$0xff] }
 0x1dc   : > { %1274 = vadd.xlane.f32.xlu0 %v1273_v45  ;;  %vm4181_vm8 = vcmp.eq.s32.totalorder %v4177_v11, %v2557_v35  ;;  %v3709_v12 = vadd.s32 %v4182_v9, %v399_v21  ;;  %v1429_v14 = vadd.f32 %v1428_v57, %v1427_v23  ;;  %v1447_v2 = vadd.f32 %v1374_v48, %v1373_v62 }
 0x1dd   : > { %v1939_v49 = vpop.eup %1938  ;;  %v1372_v37 = vsel %vm4181_vm8, %v3203_v30, 0.0  ;;  %v967_v1 = vsub.f32 %v823_v60, %v4184_v18  ;;  %v1448_v51 = vsel %vm486_vm1, %v1375_v52, 0.0  ;;  %vm4186_vm9 = vcmp.eq.s32.totalorder %v4185_v55, %v2511_v63  ;;  %v2020_v52 = vld [vmem:[%s2350_s29 + $0x168] sm:$0xff] }
 0x1de   : > { %v1287_v36 = vmul.f32 0.6931472, %v1939_v49  ;;  %v1225_v24 = vpop.xlane.xlu0 %1224  ;;  %v3713_v46 = vpop.eup %1940  ;;  %v1367_v47 = vsel %vm4186_vm9, %v3206_v53, 0.0  ;;  %vm4187_vm4 = vcmp.eq.s32.totalorder %v4185_v55, %v2543_v29  ;;  %v1442_v45 = vadd.f32 %v1371_v5, %v1370_v20  ;;  %v4190_v5 = vld [vmem:[#allocation52_spill] sm:$0xff] }
 0x1df   : > { %v1368_v30 = vsel %vm4187_vm4, %v3209_v41, 0.0  ;;  %v1943_v17 = vpop.eup %1942  ;;  %vm469_vm5 = vcmp.lt.s32.totalorder %v4118_v56, 320  ;;  %v1319_v28 = vadd.f32 %v1289_v19, %v4188_v7  ;;  %vm4189_vm6 = vcmp.eq.s32.totalorder %v4185_v55, %v2557_v35  ;;  %v4192_v56 = vld [vmem:[#allocation64_spill] sm:$0xff] }
 0x1e0   : > { %v1318_v38 = vadd.f32 %v1287_v36, %v4183_v58  ;;  %1284 = vadd.xlane.f32.xlu1 %v1283_v22  ;;  %v1369_v59 = vsel %vm4189_vm6, %v3214_v54, 0.0  ;;  %v1443_v53 = vsel %vm486_vm1, %v1372_v37, 0.0  ;;  %vm470_vm7 = vcmp.lt.s32.totalorder %v4128_v13, 320  ;;  %v2021_v36 = vld [vmem:[%s2350_s29 + $0x170] sm:$0xff]  ;;  %v2022_v37 = vld [vmem:[%s2350_s29 + $0x178] sm:$0xff] }
 0x1e1   : > { %1435 = vadd.xlane.f32.xlu2 %v1434_v27  ;;  %vm466_vm14 = vcmp.eq.s32.totalorder %v3709_v12, %v2511_v63  ;;  %vm467_vm15 = vcmp.eq.s32.totalorder %v3709_v12, %v2543_v29  ;;  %v1449_v41 = vadd.f32 %v1448_v51, %v1447_v2  ;;  %v1437_v27 = vadd.f32 %v1368_v30, %v1367_v47  ;;  %v1945_v54 = vpop.eup %1944  ;;  %v4193_v47 = vld [vmem:[#allocation63_spill] sm:$0xff] }
 0x1e2   : > { %v1386_v26 = vpop.xlane.xlu1 %1385  ;;  %vm468_vm11 = vcmp.eq.s32.totalorder %v3709_v12, %v2557_v35  ;;  %v1291_v23 = vmul.f32 0.6931472, %v1943_v17  ;;  %v1438_v49 = vsel %vm486_vm1, %v1369_v59, 0.0  ;;  %v1444_v22 = vadd.f32 %v1443_v53, %v1442_v45  ;;  %v4196_v45 = vld [vmem:[#allocation14_spill] sm:$0xff] }
 0x1e3   : > { %v1462_v25 = vsub.f32 %v1318_v38, %v1386_v26  ;;  %v1391_v60 = vpop.xlane.xlu2 %1390  ;;  %1946 = vlog2.f32 %v1230_v0  ;;  %v883_v19 = vsel %vm466_vm14, %v2020_v52, 0.0  ;;  %v884_v20 = vsel %vm467_vm15, %v2021_v36, 0.0  ;;  %v4197_v59 = vld [vmem:[#allocation66_spill] sm:$0xff] }
 0x1e4   : > { %v1463_v21 = vsub.f32 %v1319_v28, %v1391_v60  ;;  %1430 = vadd.xlane.f32.xlu0 %v1429_v14  ;;  %v824_v44 = vadd.f32 %v3672_v31, %v4190_v5  ;;  %v1379_v0 = vsel %vm466_vm14, %v3247_v61, 0.0  ;;  %v885_v9 = vsel %vm468_vm11, %v2022_v37, 0.0  ;;  %v4191_v14 = vld [vmem:[#allocation71_spill] sm:$0xff]  ;;  %v4201_v37 = vld [vmem:[#allocation72_spill] sm:$0xff] }
 0x1e5   : > { %v1478_v57 = vadd.f32 %v1462_v25, %v966_v3  ;;  %v1380_v3 = vsel %vm467_vm15, %v3250_v6, 0.0  ;;  %1948 = vlog2.f32 %v1225_v24  ;;  %v1381_v61 = vsel %vm468_vm11, %v3259_v50, 0.0  ;;  %v4195_v24 = vld [vmem:[#allocation65_spill] sm:$0xff]  ;;  %v4198_v25 = vld [vmem:[#allocation11_spill] sm:$0xff] }
 0x1e6   : > { %v1479_v62 = vadd.f32 %v1463_v21, %v967_v1  ;;  %v3739_v48 = vpop.xlane.xlu0 %1239  ;;  %v1320_v6 = vadd.f32 %v1291_v23, %v4191_v14  ;;  %v1439_v2 = vadd.f32 %v1438_v49, %v1437_v27  ;;  %v961_v18 = vadd.f32 %v884_v20, %v883_v19  ;;  %v4199_v20 = vld [vmem:[#allocation53_spill] sm:$0xff] }
 0x1e7   : > { %v1494_v58 = vsel %vm469_vm5, %v1478_v57, 0.0  ;;  %v1457_v51 = vadd.f32 %v1380_v3, %v1379_v0  ;;  %vm4194_vm0 = vcmp.eq.s32.totalorder %v4193_v47, %v2511_v63  ;;  %v1377_v30 = vsel %vm464_vm10, %v4195_v24, 0.0 }
 0x1e8   : > { %v1495_v31 = vsel %vm470_vm7, %v1479_v62, 0.0  ;;  %1445 = vadd.xlane.f32.xlu1 %v1444_v22  ;;  %v1376_v13 = vsel %vm4194_vm0, %v4192_v56, 0.0  ;;  %v962_v50 = vsel %vm486_vm1, %v885_v9, 0.0  ;;  %v968_v17 = vsub.f32 %v824_v44, %v4196_v45  ;;  %v4200_v44 = vld [vmem:[#allocation51_spill] sm:$0xff] }
 0x1e9   : > { %v1510_v38 = vadd.f32 %v1495_v31, %v1494_v58  ;;  %1450 = vadd.xlane.f32.xlu2 %v1449_v41  ;;  %v1458_v7 = vsel %vm486_vm1, %v1381_v61, 0.0  ;;  %v1378_v53 = vsel %vm465_vm13, %v4197_v59, 0.0  ;;  %v1947_v63 = vpop.eup %1946  ;;  %vm471_vm2 = vcmp.lt.s32.totalorder %v4198_v25, 320  ;;  %v4202_v58 = vld [vmem:[#allocation35_spill] sm:$0xff] }
 0x1ea   : > { %v1396_v1 = vpop.xlane.xlu1 %1395  ;;  %v1452_v29 = vadd.f32 %v1377_v30, %v1376_v13  ;;  %v963_v41 = vadd.f32 %v962_v50, %v961_v18  ;;  %v797_v27 = vmul.f32 0.6931472, %v3713_v46  ;;  %v1459_v23 = vadd.f32 %v1458_v7, %v1457_v51  ;;  %v4205_v18 = vld [vmem:[#allocation19_spill] sm:$0xff] }
 0x1eb   : > { %v1464_v26 = vsub.f32 %v1320_v6, %v1396_v1  ;;  %v1250_v28 = vpop.xlane.xlu2 %1249  ;;  %v1949_v21 = vpop.eup %1948  ;;  %v1453_v57 = vsel %vm486_vm1, %v1378_v53, 0.0  ;;  %v799_v22 = vmul.f32 0.6931472, %v1945_v54  ;;  %v1295_v62 = vmul.f32 0.6931472, %v1947_v63  ;;  %v4203_v54 = vld [vmem:[#allocation59_spill] sm:$0xff] }
 0x1ec   : > { %1440 = vadd.xlane.f32.xlu0 %v1439_v2  ;;  %v1293_v35 = vmul.f32 0.6931472, %v1949_v21  ;;  %v1454_v36 = vadd.f32 %v1453_v57, %v1452_v29  ;;  %v825_v5 = vadd.f32 %v797_v27, %v4199_v20  ;;  %v4204_v6 = vld [vmem:[#allocation16_spill] sm:$0xff]  ;;  %vm472_vm1 = vcmp.lt.s32.totalorder %v4205_v18, 320  ;;  %v4206_v56 = vld [vmem:[#allocation27_spill] sm:$0xff]  ;;  %v4208_v53 = vld [vmem:[#allocation41_spill] sm:$0xff] }
 0x1ed   : > { %v1480_v60 = vadd.f32 %v1464_v26, %v968_v17  ;;  %v826_v0 = vadd.f32 %v799_v22, %v4200_v44  ;;  %v1322_v9 = vadd.f32 %v1295_v62, %v4201_v37  ;;  %vm473_vm10 = vcmp.lt.s32.totalorder %v4206_v56, 320  ;;  %v4207_v45 = vld [vmem:[#allocation39_spill] sm:$0xff]  ;;  %v4213_v62 = vld [vmem:[#allocation17_spill] sm:$0xff] }
 0x1ee   : > { %v1245_v49 = vpop.xlane.xlu0 %1244  ;;  %v1321_v31 = vadd.f32 %v1293_v35, %v4202_v58  ;;  %1950 = vlog2.f32 %v4207_v45  ;;  %v4209_v63 = vld [vmem:[#allocation43_spill] sm:$0xff]  ;;  %v4221_v45 = vld [vmem:[#allocation54_spill] sm:$0xff]  ;;  %vm477_vm8 = vcmp.lt.s32.totalorder %v4165_v42, 320  ;;  %vm478_vm9 = vcmp.lt.s32.totalorder %v4172_v8, 320  ;;  %v4240_v8 = vld [vmem:[#allocation73_spill] sm:$0xff] }
 0x1ef   : > { %v1496_v52 = vsel %vm471_vm2, %v1480_v60, 0.0  ;;  %v970_v14 = vsub.f32 %v826_v0, %v4203_v54  ;;  %1952 = vlog2.f32 %v3678_v10  ;;  %v4210_v60 = vld [vmem:[#allocation8_spill] sm:$0xff]  ;;  %v4230_v42 = vld [vmem:[#allocation58_spill] sm:$0xff]  ;;  %vm479_vm4 = vcmp.lt.s32.totalorder %v4169_v39, 320 }
 0x1f0   : > { %v1511_v19 = vadd.f32 %v1510_v38, %v1496_v52  ;;  %964 = vadd.xlane.f32.xlu1 %v963_v41  ;;  %v969_v38 = vsub.f32 %v825_v5, %v4204_v6  ;;  %1954 = vlog2.f32 %v4208_v53  ;;  %v4211_v41 = vld [vmem:[#allocation34_spill] sm:$0xff]  ;;  %v4216_v6 = vld [vmem:[#allocation55_spill] sm:$0xff]  ;;  %v4223_v53 = vld [vmem:[#allocation21_spill] sm:$0xff]  ;;  %vm480_vm5 = vcmp.lt.s32.totalorder %v4185_v55, 320 }
 0x1f1   : > { %1460 = vadd.xlane.f32.xlu2 %v1459_v23  ;;  %1956 = vlog2.f32 %v4209_v63  ;;  %v4212_v23 = vld [vmem:[#allocation40_spill] sm:$0xff]  ;;  %vm481_vm6 = vcmp.lt.s32.totalorder %v4177_v11, 320  ;;  %vm482_vm7 = vcmp.lt.s32.totalorder %v4176_v32, 320  ;;  %vm483_vm14 = vcmp.lt.s32.totalorder %v4193_v47, 320 }
 0x1f2   : > { %1958 = vlog2.f32 %v1245_v49  ;;  %vm484_vm15 = vcmp.lt.s32.totalorder %v3709_v12, 320  ;;  %vm1533_vm11 = vcmask 0  }
 0x1f3   : > { %v1406_v3 = vpop.xlane.xlu2 %1405  ;;  %1960 = vlog2.f32 %v3739_v48 }
 0x1f4   : > { %1455 = vadd.xlane.f32.xlu0 %v1454_v36  ;;  %v1466_v46 = vsub.f32 %v1322_v9, %v1406_v3  ;;  %v1951_v17 = vpop.eup %1950  ;;  %1962 = vlog2.f32 %v4212_v23  ;;  %v4214_v36 = vld [vmem:[#allocation23_spill] sm:$0xff] }
 0x1f5   : > { %v1953_v26 = vpop.eup %1952  ;;  %v801_v59 = vmul.f32 0.6931472, %v1951_v17  ;;  %1964 = vlog2.f32 %v1250_v28  ;;  %vm474_vm13 = vcmp.lt.s32.totalorder %v4214_v36, 320 }
 0x1f6   : > { %v1401_v61 = vpop.xlane.xlu0 %1400  ;;  %v1482_v1 = vadd.f32 %v1466_v46, %v970_v14  ;;  %v1297_v25 = vmul.f32 0.6931472, %v1953_v26  ;;  %v1955_v27 = vpop.eup %1954  ;;  %v4222_v26 = vld [vmem:[#allocation62_spill] sm:$0xff] }
 0x1f7   : > { %v1465_v2 = vsub.f32 %v1321_v31, %v1401_v61  ;;  %v827_v29 = vadd.f32 %v801_v59, %v4210_v60  ;;  %v1957_v57 = vpop.eup %1956  ;;  %v803_v5 = vmul.f32 0.6931472, %v1955_v27  ;;  %v4215_v61 = vld [vmem:[#allocation56_spill] sm:$0xff]  ;;  %v4224_v60 = vld [vmem:[#allocation26_spill] sm:$0xff] }
 0x1f8   : > { %v1498_v30 = vsel %vm473_vm10, %v1482_v1, 0.0  ;;  %v1323_v21 = vadd.f32 %v1297_v25, %v4211_v41  ;;  %v1959_v35 = vpop.eup %1958  ;;  %v805_v48 = vmul.f32 0.6931472, %v1957_v57  ;;  %v4218_v1 = vld [vmem:[#allocation44_spill] sm:$0xff]  ;;  %vm475_vm3 = vcmp.lt.s32.totalorder %v4224_v60, 320  ;;  %v4235_v60 = vld [vmem:[#allocation70_spill] sm:$0xff] }
 0x1f9   : > { %v1481_v51 = vadd.f32 %v1465_v2, %v969_v38  ;;  %v971_v52 = vsub.f32 %v827_v29, %v4213_v62  ;;  %v1961_v20 = vpop.eup %1960  ;;  %v1301_v0 = vmul.f32 0.6931472, %v1959_v35  ;;  %v828_v54 = vadd.f32 %v803_v5, %v4215_v61  ;;  %v4217_v2 = vld [vmem:[#allocation38_spill] sm:$0xff] }
 0x1fa   : > { %v1963_v37 = vpop.eup %1962  ;;  %v1299_v46 = vmul.f32 0.6931472, %v1961_v20  ;;  %v829_v38 = vadd.f32 %v805_v48, %v4216_v6  ;;  %1966 = vlog2.f32 %v4218_v1  ;;  %v4227_v35 = vld [vmem:[#allocation22_spill] sm:$0xff]  ;;  %v4231_v1 = vld [vmem:[#allocation57_spill] sm:$0xff] }
 0x1fb   : > { %v1497_v13 = vsel %vm472_vm1, %v1481_v51, 0.0  ;;  %v1965_v58 = vpop.eup %1964  ;;  %v807_v14 = vmul.f32 0.6931472, %v1963_v37  ;;  %v1325_v18 = vadd.f32 %v1301_v0, %v4217_v2  ;;  %v4219_v51 = vld [vmem:[#allocation18_spill] sm:$0xff]  ;;  %v972_v63 = vsub.f32 %v828_v54, %v4223_v53 }
 0x1fc   : > { %v1512_v24 = vadd.f32 %v1511_v19, %v1497_v13  ;;  %1968 = vlog2.f32 %v4219_v51  ;;  %v1303_v56 = vmul.f32 0.6931472, %v1965_v58  ;;  %v973_v59 = vsub.f32 %v829_v38, %v4222_v26  ;;  %v4228_v5 = vld [vmem:[#allocation42_spill] sm:$0xff] }
 0x1fd   : > { %v830_v17 = vadd.f32 %v807_v14, %v4221_v45  ;;  %v4234_v45 = vld [vmem:[#allocation50_spill] sm:$0xff] }
 0x1fe   : > { %v1513_v50 = vadd.f32 %v1512_v24, %v1498_v30  ;;  %v4220_v24 = vld [vmem:[#allocation37_spill] sm:$0xff] }
 0x1ff   : > { %v1324_v30 = vadd.f32 %v1299_v46, %v4220_v24  ;;  %v974_v36 = vsub.f32 %v830_v17, %v4227_v35 }
 0x200   : > { %v1967_v23 = vpop.eup %1966 }
 0x201   : > { %v809_v37 = vmul.f32 0.6931472, %v1967_v23 }
 0x202   : > { %v1969_v62 = vpop.eup %1968 }
 0x203   : > { %v811_v61 = vmul.f32 0.6931472, %v1969_v62 }
 0x205   : > { %v832_v51 = vadd.f32 %v811_v61, %v4231_v1  ;;  %v4241_v61 = vld [vmem:[#allocation46_spill] sm:$0xff] }
 0x233   : > { %v1255_v7 = vpop.xlane.xlu1 %1254 }
 0x23b   : > { %v1411_v10 = vpop.xlane.xlu1 %1410 }
 0x23c   : > { %v1265_v22 = vpop.xlane.xlu2 %1264  ;;  %v1467_v19 = vsub.f32 %v1323_v21, %v1411_v10  ;;  %v4225_v21 = vld [vmem:[#allocation36_spill] sm:$0xff]  ;;  %v4226_v10 = vld [vmem:[#allocation30_spill] sm:$0xff] }
 0x23d   : > { %v1326_v27 = vadd.f32 %v1303_v56, %v4225_v21  ;;  %vm476_vm12 = vcmp.lt.s32.totalorder %v4226_v10, 320 }
 0x23e   : > { %v1483_v49 = vadd.f32 %v1467_v19, %v971_v52 }
 0x23f   : > { %v1260_v44 = vpop.xlane.xlu0 %1259 }
 0x240   : > { %v1499_v3 = vsel %vm474_vm13, %v1483_v49, 0.0  ;;  %1970 = vlog2.f32 %v1260_v44  ;;  %v4229_v44 = vld [vmem:[#allocation49_spill] sm:$0xff] }
 0x241   : > { %v1514_v9 = vadd.f32 %v1513_v50, %v1499_v3  ;;  %1972 = vlog2.f32 %v1255_v7 }
 0x242   : > { %1974 = vlog2.f32 %v4228_v5 }
 0x243   : > { %v1270_v31 = vpop.xlane.xlu1 %1269  ;;  %1976 = vlog2.f32 %v4229_v44 }
 0x244   : > { %v1421_v28 = vpop.xlane.xlu2 %1420  ;;  %1978 = vlog2.f32 %v1270_v31 }
 0x245   : > { %v1469_v13 = vsub.f32 %v1325_v18, %v1421_v28  ;;  %1980 = vlog2.f32 %v1265_v22  ;;  %v831_v18 = vadd.f32 %v809_v37, %v4230_v42 }
 0x246   : > { %v1971_v20 = vpop.eup %1970 }
 0x247   : > { %v1416_v50 = vpop.xlane.xlu0 %1415  ;;  %v1485_v29 = vadd.f32 %v1469_v13, %v973_v59  ;;  %v1973_v3 = vpop.eup %1972  ;;  %v1307_v54 = vmul.f32 0.6931472, %v1971_v20  ;;  %v4232_v13 = vld [vmem:[#allocation47_spill] sm:$0xff] }
 0x248   : > { %v1468_v25 = vsub.f32 %v1324_v30, %v1416_v50  ;;  %v1305_v38 = vmul.f32 0.6931472, %v1973_v3  ;;  %v1975_v28 = vpop.eup %1974  ;;  %v4233_v50 = vld [vmem:[#allocation45_spill] sm:$0xff] }
 0x249   : > { %v1501_v48 = vsel %vm476_vm12, %v1485_v29, 0.0  ;;  %v1977_v2 = vpop.eup %1976  ;;  %v1328_v24 = vadd.f32 %v1307_v54, %v4232_v13  ;;  %v813_v59 = vmul.f32 0.6931472, %v1975_v28  ;;  %v976_v29 = vsub.f32 %v832_v51, %v4235_v60 }
 0x24a   : > { %v1484_v41 = vadd.f32 %v1468_v25, %v972_v63  ;;  %v1979_v31 = vpop.eup %1978  ;;  %v1327_v17 = vadd.f32 %v1305_v38, %v4234_v45  ;;  %v815_v53 = vmul.f32 0.6931472, %v1977_v2  ;;  %v4242_v38 = vld [vmem:[#allocation67_spill] sm:$0xff] }
 0x24b   : > { %v1426_v57 = vpop.xlane.xlu1 %1425  ;;  %v1981_v30 = vpop.eup %1980  ;;  %v1311_v25 = vmul.f32 0.6931472, %v1979_v31 }
 0x24c   : > { %v1500_v52 = vsel %vm475_vm3, %v1484_v41, 0.0  ;;  %v1280_v19 = vpop.xlane.xlu2 %1279  ;;  %v1470_v49 = vsub.f32 %v1326_v27, %v1426_v57  ;;  %v4236_v41 = vld [vmem:[#allocation60_spill] sm:$0xff]  ;;  %v1309_v23 = vmul.f32 0.6931472, %v1981_v30 }
 0x24d   : > { %v1515_v7 = vadd.f32 %v1514_v9, %v1500_v52  ;;  %v975_v21 = vsub.f32 %v831_v18, %v4236_v41  ;;  %v4237_v52 = vld [vmem:[#allocation9_spill] sm:$0xff] }
 0x24e   : > { %v1486_v0 = vadd.f32 %v1470_v49, %v974_v36  ;;  %v833_v35 = vadd.f32 %v813_v59, %v4237_v52  ;;  %v4238_v36 = vld [vmem:[#allocation12_spill] sm:$0xff]  ;;  %v1329_v54 = vadd.f32 %v1309_v23, %v4241_v61 }
 0x24f   : > { %v1516_v46 = vadd.f32 %v1515_v7, %v1501_v48  ;;  %v1275_v58 = vpop.xlane.xlu0 %1274  ;;  %v834_v49 = vadd.f32 %v815_v53, %v4238_v36  ;;  %v4239_v48 = vld [vmem:[#allocation48_spill] sm:$0xff] }
 0x250   : > { %v1502_v14 = vsel %vm477_vm8, %v1486_v0, 0.0  ;;  %1982 = vlog2.f32 %v1275_v58  ;;  %v1330_v0 = vadd.f32 %v1311_v25, %v4239_v48  ;;  %v4245_v25 = vld [vmem:[#allocation24_spill] sm:$0xff] }
 0x251   : > { %v1517_v6 = vadd.f32 %v1516_v46, %v1502_v14  ;;  %1984 = vlog2.f32 %v4233_v50  ;;  %v978_v28 = vsub.f32 %v834_v49, %v4242_v38  ;;  %v1531_v36 = vld [vmem:[%s2372_s8] sm:$0x1] }
 0x253   : > { %v1285_v9 = vpop.xlane.xlu1 %1284 }
 0x254   : > { %v1436_v56 = vpop.xlane.xlu2 %1435  ;;  %1986 = vlog2.f32 %v1285_v9  ;;  %v4243_v9 = vld [vmem:[#allocation61_spill] sm:$0xff] }
 0x255   : > { %v1472_v22 = vsub.f32 %v1328_v24, %v1436_v56  ;;  %1988 = vlog2.f32 %v1280_v19  ;;  %v977_v2 = vsub.f32 %v833_v35, %v4243_v9 }
 0x256   : > { %v1983_v26 = vpop.eup %1982 }
 0x257   : > { %v1431_v63 = vpop.xlane.xlu0 %1430  ;;  %v1313_v10 = vmul.f32 0.6931472, %v1983_v26  ;;  %v1488_v57 = vadd.f32 %v1472_v22, %v976_v29  ;;  %v1985_v5 = vpop.eup %1984 }
 0x258   : > { %v1471_v27 = vsub.f32 %v1327_v17, %v1431_v63  ;;  %v821_v18 = vmul.f32 0.6931472, %v1985_v5  ;;  %v4244_v17 = vld [vmem:[#allocation15_spill] sm:$0xff] }
 0x259   : > { %v1504_v37 = vsel %vm479_vm4, %v1488_v57, 0.0  ;;  %v1331_v46 = vadd.f32 %v1313_v10, %v4240_v8 }
 0x25a   : > { %v1487_v62 = vadd.f32 %v1471_v27, %v975_v21  ;;  %v1987_v3 = vpop.eup %1986  ;;  %v837_v26 = vadd.f32 %v821_v18, %v4244_v17 }
 0x25b   : > { %v1446_v20 = vpop.xlane.xlu1 %1445  ;;  %v1989_v14 = vpop.eup %1988  ;;  %v1317_v1 = vmul.f32 0.6931472, %v1987_v3 }
 0x25c   : > { %v1503_v7 = vsel %vm478_vm9, %v1487_v62, 0.0  ;;  %v1451_v44 = vpop.xlane.xlu2 %1450  ;;  %v1474_v58 = vsub.f32 %v1330_v0, %v1446_v20 }
 0x25d   : > { %v1518_v19 = vadd.f32 %v1517_v6, %v1503_v7  ;;  %v1475_v51 = vsub.f32 %v1331_v46, %v1451_v44  ;;  %v1315_v6 = vmul.f32 0.6931472, %v1989_v14  ;;  %v1333_v45 = vadd.f32 %v1317_v1, %v3589_v34 }
 0x25e   : > { %v1490_v13 = vadd.f32 %v1474_v58, %v978_v28 }
 0x25f   : > { %v1519_v39 = vadd.f32 %v1518_v19, %v1504_v37  ;;  %v1441_v42 = vpop.xlane.xlu0 %1440  ;;  %v1491_v30 = vadd.f32 %v1475_v51, %v979_v43  ;;  %v1332_v60 = vadd.f32 %v1315_v6, %v4245_v25 }
 0x260   : > { %v1473_v56 = vsub.f32 %v1329_v54, %v1441_v42  ;;  %v1506_v55 = vsel %vm481_vm6, %v1490_v13, 0.0 }
 0x261   : > { %v1507_v41 = vsel %vm482_vm7, %v1491_v30, 0.0 }
 0x262   : > { %v1489_v24 = vadd.f32 %v1473_v56, %v977_v2 }
 0x263   : > { %v965_v31 = vpop.xlane.xlu1 %964 }
 0x264   : > { %v1505_v50 = vsel %vm480_vm5, %v1489_v24, 0.0  ;;  %v1461_v22 = vpop.xlane.xlu2 %1460  ;;  %v981_v63 = vsub.f32 %v837_v26, %v965_v31 }
 0x265   : > { %v1520_v59 = vadd.f32 %v1519_v39, %v1505_v50  ;;  %v1477_v53 = vsub.f32 %v1333_v45, %v1461_v22 }
 0x267   : > { %v1521_v11 = vadd.f32 %v1520_v59, %v1506_v55  ;;  %v1456_v29 = vpop.xlane.xlu0 %1455  ;;  %v1493_v43 = vadd.f32 %v1477_v53, %v981_v63 }
 0x268   : > { %v1476_v4 = vsub.f32 %v1332_v60, %v1456_v29 }
 0x269   : > { %v1522_v16 = vadd.f32 %v1521_v11, %v1507_v41  ;;  %v1509_v27 = vsel %vm484_vm15, %v1493_v43, 0.0 }
 0x26a   : > { %v1492_v34 = vadd.f32 %v1476_v4, %v980_v40 }
 0x26c   : > { %v1508_v32 = vsel %vm483_vm14, %v1492_v34, 0.0 }
 0x26d   : > { %v1523_v21 = vadd.f32 %v1522_v16, %v1508_v32 }
 0x26f   : > { %v1524_v23 = vadd.f32 %v1523_v21, %v1509_v27 }
 0x271   : > { %v1525_v10 = vrot.slane %v1524_v23, 4 }
 0x273   : > { %v1526_v57 = vadd.f32 %v1525_v10, %v1524_v23 }
 0x275   : > { %v1527_v62 = vrot.slane %v1526_v57, 2 }
 0x277   : > { %v1528_v52 = vadd.f32 %v1527_v62, %v1526_v57 }
 0x279   : > { %v1529_v35 = vrot.slane %v1528_v52, 1 }
 0x27b   : > { %v1530_v47 = vadd.f32 %v1529_v35, %v1528_v52 }
 0x27d   : > { %v1532_v49 = vadd.f32 %v1531_v36, %v1530_v47 }
 0x27f   : > { %1534 = vst.msk [vmem:[%s2372_s8] sm:$0x1] %vm1533_vm11, %v1532_v49 }
 0x280 PF: > { %s18_s16 = sadd.s32 1, %s2171_s16   ;;  %s4246_s9 = smov %s2147_s10 }
 0x281   : > { %p15_p9 = scmp.ge.s32.totalorder %s18_s16, 6   ;;  %s4247_s10 = smov %s2151_s11 }
 0x282   : > { %s4248_s11 = smov %s2262_s28  ;;  %s4249_s12 = smov %s2163_s14 }
 0x283   : > { %s4250_s13 = smov %s2167_s15  ;;  %s4251_s14 = smov %s4254_s17 }
 0x284   : > { %s4252_s15 = smov %s4258_s18  ;;  %17 = sbr.rel (!%p15_p9) target bundleno = 7 (0x7), region = 85 }
 0x289   :  { %1552 = vsyncpa [#allocation3], 1 }
 0x28a   :  { %1554 = vsyncpa [#allocation3 + $0x1], 1 }
 0x28b   :  { %1555 = vsyncpa [#allocation5], 1 }
 0x28c   :  { %1557 = vsyncpa [#allocation5 + $0x1], 1 }

</bundles_post_ra>
